<compile_context>
chip_gen: v7x
topology: tpu7x:2x2x1
jax: 0.10.0
libtpu: 0.0.40
codegen_flags: <defaults>
</compile_context>

<pallas_src>
import math
import numpy as np

import jax
import jax.numpy as jnp
from jax import lax
from jax.experimental import pallas as pl
from jax.experimental.pallas import tpu as pltpu

_VMEM_LIMIT = 32 * 1024 * 1024  # safe on v5e/v6e/v7x; tiles below stay far under it


# ----------------------------------------------------------------------------
# Kernel 1: adaptive-avg-pool (all scales stacked) + per-scale 1x1 conv+BN+ReLU
# ----------------------------------------------------------------------------
def _make_ppm_pool_kernel(Stot, Cp, n_scales, scale_offs, scale_sizes):
    CpT = n_scales * Cp

    def kernel(x_ref, p_ref, w_ref, g_ref, b_ref, y_ref, acc_ref):
        hw = pl.program_id(1)

        @pl.when(hw == 0)
        def _init():
            acc_ref[...] = jnp.zeros_like(acc_ref)

        # partial pooled features: accumulate P_tile @ x_tile over the HW tiles
        acc_ref[...] += jnp.dot(p_ref[...], x_ref[0],
                                preferred_element_type=jnp.float32)

        @pl.when(hw == pl.num_programs(1) - 1)
        def _epilogue():
            # per-scale 1x1 conv + folded BN + ReLU, written block-diagonally so
            # the upsample/concat kernel needs only ONE matmul for all scales.
            y_ref[0] = jnp.zeros((Stot, CpT), y_ref.dtype)
            for i in range(n_scales):
                off, s2 = scale_offs[i], scale_sizes[i]
                pooled = acc_ref[off:off + s2, :].astype(jnp.bfloat16)
                yi = jnp.dot(pooled, w_ref[i], preferred_element_type=jnp.float32)
                yi = jnp.maximum(yi * g_ref[i] + b_ref[i], 0.0)
                y_ref[0, off:off + s2, i * Cp:(i + 1) * Cp] = yi.astype(y_ref.dtype)

    return kernel


def ppm_pool_project(x_flat, P_all, w_all, g_all, b_all, *, hw_tile, scale_sizes):
    N, HW, C5 = x_flat.shape
    Stot = P_all.shape[0]
    n_scales, _, Cp = w_all.shape
    tP = hw_tile if (HW % hw_tile == 0) else HW

    offs, running = [], 0
    for s2 in scale_sizes:
        offs.append(running)
        running += s2

    kern = _make_ppm_pool_kernel(Stot, Cp, n_scales, tuple(offs), tuple(scale_sizes))
    return pl.pallas_call(
        kern,
        out_shape=jax.ShapeDtypeStruct((N, Stot, n_scales * Cp), jnp.bfloat16),
        grid=(N, HW // tP),
        in_specs=[
            pl.BlockSpec((1, tP, C5), lambda n, p: (n, p, 0)),
            pl.BlockSpec((Stot, tP), lambda n, p: (0, p)),
            pl.BlockSpec((n_scales, C5, Cp), lambda n, p: (0, 0, 0)),
            pl.BlockSpec((n_scales, 1, Cp), lambda n, p: (0, 0, 0)),
            pl.BlockSpec((n_scales, 1, Cp), lambda n, p: (0, 0, 0)),
        ],
        out_specs=pl.BlockSpec((1, Stot, n_scales * Cp), lambda n, p: (n, 0, 0)),
        scratch_shapes=[pltpu.VMEM((Stot, C5), jnp.float32)],
        compiler_params=pltpu.CompilerParams(
            dimension_semantics=("parallel", "arbitrary"),
            vmem_limit_bytes=_VMEM_LIMIT),
    )(x_flat, P_all, w_all, g_all, b_all)


# ----------------------------------------------------------------------------
# Kernel 2: bilinear upsample (all scales in one matmul) + channel concat with x,
#           written straight into a column-padded NHWC buffer (ready for K3).
# ----------------------------------------------------------------------------
def _make_ppm_upsample_concat_kernel(rH, W, C5, Ctot):
    Wp = W + 2

    def kernel(x_ref, y_ref, u_ref, o_ref):
        zcol = jnp.zeros((rH, 1, Ctot), o_ref.dtype)
        o_ref[0, :, 0:1, :] = zcol                  # left conv pad column
        o_ref[0, :, Wp - 1:Wp, :] = zcol            # right conv pad column
        o_ref[0, :, 1:W + 1, 0:C5] = x_ref[0]       # pass-through channels of x
        # one matmul upsamples all scales (y_bd is block-diagonal over scales)
        up = jnp.dot(u_ref[...], y_ref[0], preferred_element_type=jnp.float32)
        o_ref[0, :, 1:W + 1, C5:Ctot] = up.reshape(rH, W, Ctot - C5).astype(o_ref.dtype)

    return kernel


def ppm_upsample_concat(x_nhwc, y_bd, U_all, *, rH):
    N, H, W, C5 = x_nhwc.shape
    Stot = U_all.shape[1]
    CpT = y_bd.shape[-1]
    Ctot = C5 + CpT
    assert H % rH == 0 and U_all.shape[0] == H * W

    kern = _make_ppm_upsample_concat_kernel(rH, W, C5, Ctot)
    return pl.pallas_call(
        kern,
        out_shape=jax.ShapeDtypeStruct((N, H, W + 2, Ctot), jnp.bfloat16),
        grid=(N, H // rH),
        in_specs=[
            pl.BlockSpec((1, rH, W, C5), lambda n, j: (n, j, 0, 0)),
            pl.BlockSpec((1, Stot, CpT), lambda n, j: (n, 0, 0)),
            pl.BlockSpec((rH * W, Stot), lambda n, j: (j, 0)),
        ],
        out_specs=pl.BlockSpec((1, rH, W + 2, Ctot), lambda n, j: (n, j, 0, 0)),
        compiler_params=pltpu.CompilerParams(
            dimension_semantics=("parallel", "parallel"),
            vmem_limit_bytes=_VMEM_LIMIT),
    )(x_nhwc, y_bd, U_all)


# ----------------------------------------------------------------------------
# Kernel 3: 3x3 conv (in-kernel shifted taps, 1-row halo) + BN + ReLU
#           + Dropout2d(identity) + fused 1x1 conv (bias) -> 1-channel logits.
# ----------------------------------------------------------------------------
def _make_conv3x3_bn_relu_proj_kernel(rH, W, Cmid):
    Lp = rH * W

    def kernel(xc_ref, top_ref, bot_ref, w_ref, g_ref, b_ref, w2_ref, b2_ref,
               o_ref, acc_ref):
        k = pl.program_id(2)

        @pl.when(k == 0)
        def _init():
            acc_ref[...] = jnp.zeros_like(acc_ref)

        # (rH+2, W+2, tK) window: top halo row + rH centre rows + bottom halo row
        xwin = jnp.concatenate([top_ref[0], xc_ref[0], bot_ref[0]], axis=0)
        tK = xwin.shape[-1]

        part = None
        for dh in range(3):
            for dw in range(3):
                tap = xwin[dh:dh + rH, dw:dw + W, :].reshape(Lp, tK)
                d = jnp.dot(tap, w_ref[dh * 3 + dw],
                            preferred_element_type=jnp.float32)
                part = d if part is None else part + d
        acc_ref[...] += part

        @pl.when(k == pl.num_programs(2) - 1)
        def _epilogue():
            # folded BN + ReLU (Dropout2d is identity at inference)
            y = jnp.maximum(acc_ref[...] * g_ref[...] + b_ref[...], 0.0)
            # fused 1x1 conv (Cmid -> 1) + bias as a VPU reduction; store a
            # lane-dense (rH, W) tile straight into the NCHW logits.
            y3 = y.reshape(rH, W, Cmid)
            w2 = w2_ref[...].reshape(1, 1, Cmid)
            o_ref[0, 0] = jnp.sum(y3 * w2, axis=-1) + b2_ref[...]

    return kernel


def _fit_k_tile(cin, want):
    if cin % 128 == 0:
        for t in (want, 512, 256, 128):
            if t % 128 == 0 and cin % t == 0:
                return t
    return cin


def conv3x3_bn_relu_proj(xc, top, bot, w_taps, bn_g, bn_b, w2, b2, *, rH, k_tile):
    N, H, Wp, Cin = xc.shape
    W = Wp - 2
    assert H % rH == 0
    J = H // rH
    Cmid = w_taps.shape[-1]
    tK = _fit_k_tile(Cin, k_tile)
    K = Cin // tK
    assert top.shape == (N, J, Wp, Cin) and bot.shape == (N, J, Wp, Cin)

    kern = _make_conv3x3_bn_relu_proj_kernel(rH, W, Cmid)
    return pl.pallas_call(
        kern,
        out_shape=jax.ShapeDtypeStruct((N, 1, H, W), jnp.float32),
        grid=(N, J, K),
        in_specs=[
            pl.BlockSpec((1, rH, Wp, tK), lambda n, j, k: (n, j, 0, k)),
            pl.BlockSpec((1, 1, Wp, tK), lambda n, j, k: (n, j, 0, k)),
            pl.BlockSpec((1, 1, Wp, tK), lambda n, j, k: (n, j, 0, k)),
            pl.BlockSpec((9, tK, Cmid), lambda n, j, k: (0, k, 0)),
            pl.BlockSpec((1, Cmid), lambda n, j, k: (0, 0)),
            pl.BlockSpec((1, Cmid), lambda n, j, k: (0, 0)),
            pl.BlockSpec((1, Cmid), lambda n, j, k: (0, 0)),
            pl.BlockSpec((1, 1), lambda n, j, k: (0, 0)),
        ],
        out_specs=pl.BlockSpec((1, 1, rH, W), lambda n, j, k: (n, 0, j, 0)),
        scratch_shapes=[pltpu.VMEM((rH * W, Cmid), jnp.float32)],
        compiler_params=pltpu.CompilerParams(
            dimension_semantics=("parallel", "parallel", "arbitrary"),
            vmem_limit_bytes=_VMEM_LIMIT),
    )(xc, top, bot, w_taps, bn_g, bn_b, w2, b2)


# ------------------------- JAX glue (small, no 9x copies) -------------------------
def adaptive_pool_matrix(in_size, out_size):
    """Row i averages input bin [floor(i*in/out), ceil((i+1)*in/out)) (PyTorch)."""
    P = np.zeros((out_size, in_size), np.float32)
    for i in range(out_size):
        start = (i * in_size) // out_size
        end = -((-(i + 1) * in_size) // out_size)
        P[i, start:end] = 1.0 / float(end - start)
    return P


def bilinear_matrix(in_size, out_size):
    """PyTorch bilinear interpolation (align_corners=False) as a (out, in) map."""
    U = np.zeros((out_size, in_size), np.float32)
    if in_size == 1:
        U[:, 0] = 1.0
        return U
    scale = in_size / out_size
    for i in range(out_size):
        src = max((i + 0.5) * scale - 0.5, 0.0)
        x0 = min(int(math.floor(src)), in_size - 1)
        x1 = x0 + 1 if x0 < in_size - 1 else x0
        l1 = src - x0
        U[i, x0] += 1.0 - l1
        U[i, x1] += l1
    return U


def build_ppm_mats(H, W, pool_scales):
    """Precomputed (hoisted) pooling / upsample matrices for all scales."""
    P_list, U_list = [], []
    for s in pool_scales:
        P_list.append(np.kron(adaptive_pool_matrix(H, s), adaptive_pool_matrix(W, s)))
        U_list.append(np.kron(bilinear_matrix(s, H), bilinear_matrix(s, W)))
    P = np.concatenate(P_list, axis=0).astype(np.float32)   # (Stot, HW)
    U = np.concatenate(U_list, axis=1).astype(np.float32)   # (HW, Stot)
    return {
        "P_f32": jnp.asarray(P), "U_f32": jnp.asarray(U),
        "P_bf16": jnp.asarray(P).astype(jnp.bfloat16),
        "U_bf16": jnp.asarray(U).astype(jnp.bfloat16),
        "scale_sizes": tuple(s * s for s in pool_scales),
    }


def build_row_halos(xpadc, rH):
    """Rows just above / below each rH-row tile of a column-padded NHWC map.

    Returns (top, bot) of shape (N, H//rH, W+2, C); zero rows at the image border
    (these are the 3x3 conv's zero-padding rows)."""
    N, H, Wp, C = xpadc.shape
    J = H // rH
    zero = jnp.zeros((N, 1, Wp, C), xpadc.dtype)
    if J == 1:
        return zero, zero
    top = jnp.concatenate([zero, xpadc[:, rH - 1:H - 1:rH]], axis=1)
    bot = jnp.concatenate([xpadc[:, rH::rH], zero], axis=1)
    return top, bot


def fold_bn(gamma, beta, mean, var, eps=1e-5):
    scale = gamma / jnp.sqrt(var + eps)
    bias = beta - mean * scale
    return (scale.reshape(1, -1).astype(jnp.float32),
            bias.reshape(1, -1).astype(jnp.float32))


# ------------------------- parameters -------------------------
def init_params(key, fc_dim, ppm_ch, mid_ch, n_scales):
    ks = iter(jax.random.split(key, 64))

    def nrm(shape, s=0.1):
        return (s * jax.random.normal(next(ks), shape)).astype(jnp.float32)

    def bn(c):
        gamma = 1.0 + 0.1 * jax.random.normal(next(ks), (c,))
        beta = 0.1 * jax.random.normal(next(ks), (c,))
        mean = 0.1 * jax.random.normal(next(ks), (c,))
        var = 0.5 + 0.1 * jnp.abs(jax.random.normal(next(ks), (c,)))
        return fold_bn(gamma, beta, mean, var)

    p = {}
    p["ppm_w"] = [nrm((fc_dim, ppm_ch)) for _ in range(n_scales)]   # 1x1 conv as (Cin, Cp)
    p["ppm_bn"] = [bn(ppm_ch) for _ in range(n_scales)]
    ctot = fc_dim + n_scales * ppm_ch
    p["cl_w_oihw"] = nrm((mid_ch, ctot, 3, 3))                      # torch (Cout, Cin, kh, kw)
    p["cl_bn"] = bn(mid_ch)
    p["cl2_w"] = nrm((mid_ch, 1))
    p["cl2_b"] = nrm((1,))
    c4, cds = fc_dim // 2, fc_dim // 4
    p["ds_w_oihw"] = nrm((cds, c4, 3, 3))
    p["ds_bn"] = bn(cds)
    p["ds2_w"] = nrm((cds, 1))
    p["ds2_b"] = nrm((1,))
    return p


def prepare_kernel_params(p):
    """Kernel-ready layouts: bf16 MXU operands, stacked weights, f32 epilogues."""
    def taps(w_oihw):
        cout, cin, _, _ = w_oihw.shape
        return jnp.transpose(w_oihw, (2, 3, 1, 0)).reshape(9, cin, cout).astype(jnp.bfloat16)

    kp = {}
    kp["ppm_w"] = jnp.stack(p["ppm_w"]).astype(jnp.bfloat16)            # (nsc, C5, Cp)
    kp["ppm_g"] = jnp.stack([s for s, _ in p["ppm_bn"]])                # (nsc, 1, Cp) f32
    kp["ppm_b"] = jnp.stack([b for _, b in p["ppm_bn"]])
    kp["cl_w"] = taps(p["cl_w_oihw"])                                   # (9, Ctot, mid)
    kp["cl_g"], kp["cl_b"] = p["cl_bn"]
    kp["cl2_w"] = p["cl2_w"].reshape(1, -1)                             # (1, mid) f32
    kp["cl2_b"] = p["cl2_b"].reshape(1, 1)
    kp["ds_w"] = taps(p["ds_w_oihw"])
    kp["ds_g"], kp["ds_b"] = p["ds_bn"]
    kp["ds2_w"] = p["ds2_w"].reshape(1, -1)
    kp["ds2_b"] = p["ds2_b"].reshape(1, 1)
    return kp


# ------------------------- forward -------------------------
def ppm_deepsup_forward(conv_out, kp, mats, pool_scales=(1, 2, 3, 6), *,
                        row_tile=8, hw_tile=512, k_tile=512, segSize=None):
    x = conv_out[-1]        # (N, C5, H, W)      NCHW, like the PyTorch module
    deep = conv_out[-2]     # (N, C5//2, Hd, Wd) NCHW
    N, C5, H, W = x.shape
    rH = row_tile if (H % row_tile == 0) else H

    # channels-last + bf16 MXU operands (f32 accumulation inside the kernels)
    x_nhwc = jnp.transpose(x, (0, 2, 3, 1)).astype(jnp.bfloat16)
    x_flat = x_nhwc.reshape(N, H * W, C5)                       # free reshape

    # --- PPM: pooled 1x1 conv + BN + ReLU for all scales (x read once) ---
    y_bd = ppm_pool_project(x_flat, mats["P_bf16"], kp["ppm_w"], kp["ppm_g"],
                            kp["ppm_b"], hw_tile=hw_tile,
                            scale_sizes=mats["scale_sizes"])

    # --- bilinear upsample + concat, written directly column-padded for the conv ---
    cat_pad = ppm_upsample_concat(x_nhwc, y_bd, mats["U_bf16"], rH=rH)

    # --- conv_last: 3x3 conv + BN + ReLU + Dropout2d(identity) + 1x1 conv+bias ---
    top_c, bot_c = build_row_halos(cat_pad, rH)
    out = conv3x3_bn_relu_proj(cat_pad, top_c, bot_c, kp["cl_w"], kp["cl_g"],
                               kp["cl_b"], kp["cl2_w"], kp["cl2_b"],
                               rH=rH, k_tile=k_tile)

    # TODO(synk): segSize path (bilinear resize of `out` to segSize, return [out])
    # is not implemented; this reproduces the default segSize=None branch.

    # --- deep supervision: cbr_deepsup + Dropout2d(identity) + conv_last_deepsup ---
    Nd, C4, Hd, Wd = deep.shape
    rHd = row_tile if (Hd % row_tile == 0) else Hd
    d_nhwc = jnp.transpose(deep, (0, 2, 3, 1)).astype(jnp.bfloat16)
    d_pad = jnp.pad(d_nhwc, ((0, 0), (0, 0), (1, 1), (0, 0)))
    top_d, bot_d = build_row_halos(d_pad, rHd)
    d_out = conv3x3_bn_relu_proj(d_pad, top_d, bot_d, kp["ds_w"], kp["ds_g"],
                                 kp["ds_b"], kp["ds2_w"], kp["ds2_b"],
                                 rH=rHd, k_tile=k_tile)

    return ([out], d_out)


# ------------------------- pure-JAX f32 reference -------------------------
def reference_forward(conv_out, p, mats, pool_scales):
    x, deep = conv_out[-1], conv_out[-2]
    N, C5, H, W = x.shape
    xf = jnp.transpose(x, (0, 2, 3, 1)).reshape(N, H * W, C5)
    feats, off = [xf], 0
    for i, s in enumerate(pool_scales):
        s2 = s * s
        P = mats["P_f32"][off:off + s2]
        U = mats["U_f32"][:, off:off + s2]
        pooled = jnp.einsum("ph,nhc->npc", P, xf)
        y = jnp.einsum("npc,cd->npd", pooled, p["ppm_w"][i])
        sc, bi = p["ppm_bn"][i]
        y = jnp.maximum(y * sc[None] + bi[None], 0.0)
        feats.append(jnp.einsum("hp,npd->nhd", U, y))
        off += s2
    cat = jnp.concatenate(feats, axis=-1)
    cat_nchw = jnp.transpose(cat.reshape(N, H, W, -1), (0, 3, 1, 2))

    def head(z, w_oihw, bn, w2, b2):
        y = lax.conv_general_dilated(z, w_oihw, (1, 1), ((1, 1), (1, 1)),
                                     dimension_numbers=("NCHW", "OIHW", "NCHW"))
        sc, bi = bn
        y = jnp.maximum(y * sc.reshape(1, -1, 1, 1) + bi.reshape(1, -1, 1, 1), 0.0)
        return jnp.einsum("nchw,cd->ndhw", y, w2) + b2.reshape(1, 1, 1, 1)

    out = head(cat_nchw, p["cl_w_oihw"], p["cl_bn"], p["cl2_w"], p["cl2_b"])
    d = head(deep, p["ds_w_oihw"], p["ds_bn"], p["ds2_w"], p["ds2_b"])
    return out, d


# ------------------------- main -------------------------
if __name__ == "__main__":
    key = jax.random.PRNGKey(0)
    k5, k4, kprm = jax.random.split(key, 3)

    # Small shapes consistent with the module; channel counts are multiples of 128
    # so the channel-reduction tiling uses lane-aligned blocks (still < 1 MB tensors).
    N = 2
    fc_dim = 256          # stands in for 4096
    ppm_ch = 128          # stands in for 512 (PPM branch channels)
    mid_ch = 128          # stands in for 512 (conv_last hidden channels)
    H = W = 16
    pool_scales = (1, 2, 3, 6)

    conv5 = jax.random.normal(k5, (N, fc_dim, H, W), jnp.float32)        # conv_out[-1]
    conv4 = jax.random.normal(k4, (N, fc_dim // 2, H, W), jnp.float32)   # conv_out[-2]

    params = init_params(kprm, fc_dim, ppm_ch, mid_ch, len(pool_scales))
    kparams = prepare_kernel_params(params)
    mats = build_ppm_mats(H, W, pool_scales)     # hoisted: built once, reused every call

    # demo tile sizes exercise 2 HW reduction steps, 2 row tiles, 3 channel K-steps
    (outs, deepsup) = ppm_deepsup_forward([conv4, conv5], kparams, mats, pool_scales,
                                          row_tile=8, hw_tile=128, k_tile=256)
    jax.block_until_ready(outs[0])
    jax.block_until_ready(deepsup)

    assert outs[0].shape == (N, 1, H, W), outs[0].shape
    assert deepsup.shape == (N, 1, H, W), deepsup.shape
    assert outs[0].dtype == jnp.float32 and deepsup.dtype == jnp.float32

    # numerical self-check vs a pure-JAX f32 reference (bf16 MXU inputs -> loose tol)
    ref_out, ref_d = reference_forward([conv4, conv5], params, mats, pool_scales)

    def scaled_err(a, b):
        return float(jnp.max(jnp.abs(a - b)) / (jnp.max(jnp.abs(b)) + 1e-6))

    e1 = scaled_err(outs[0], ref_out)
    e2 = scaled_err(deepsup, ref_d)
    assert e1 < 5e-2 and e2 < 5e-2, (e1, e2)

    print("KERNEL_OK")
</pallas_src>

<mosaic_0001>
module attributes {stable_mosaic.version = 11 : i64} {
  func.func @kernel(%arg0: i32, %arg1: i32, %arg2: memref<1x128x256xbf16, #tpu.memory_space<vmem>>, %arg3: memref<50x128xbf16, #tpu.memory_space<vmem>>, %arg4: memref<4x256x128xbf16, #tpu.memory_space<vmem>>, %arg5: memref<4x1x128xf32, #tpu.memory_space<vmem>>, %arg6: memref<4x1x128xf32, #tpu.memory_space<vmem>>, %arg7: memref<1x50x512xbf16, #tpu.memory_space<vmem>>, %arg8: memref<50x256xf32, #tpu.memory_space<vmem>>) attributes {dimension_semantics = [#tpu.dimension_semantics<parallel>, #tpu.dimension_semantics<arbitrary>], iteration_bounds = array<i64: 2, 2>, scalar_prefetch = 0 : i64, scratch_operands = 1 : i64, tpu.core_type = #tpu.core_type<tc>, window_params = [{transform_indices = @transform_0, window_bounds = array<i64: 1, 128, 256>}, {transform_indices = @transform_1, window_bounds = array<i64: 50, 128>}, {pipeline_mode = #tpu.pipeline_mode<synchronous>, transform_indices = @transform_2, window_bounds = array<i64: 4, 256, 128>}, {pipeline_mode = #tpu.pipeline_mode<synchronous>, transform_indices = @transform_3, window_bounds = array<i64: 4, 1, 128>}, {pipeline_mode = #tpu.pipeline_mode<synchronous>, transform_indices = @transform_4, window_bounds = array<i64: 4, 1, 128>}, {transform_indices = @transform_5, window_bounds = array<i64: 1, 50, 512>}]} {
    %c0_i32 = arith.constant 0 : i32
    %0 = arith.cmpi eq, %arg1, %c0_i32 : i32
    %1 = arith.extui %0 : i1 to i32
    %c0_i32_0 = arith.constant 0 : i32
    %2 = arith.cmpi ne, %1, %c0_i32_0 : i32
    scf.if %2 {
      %cst_10 = arith.constant 0.000000e+00 : f32
      %13 = vector.broadcast %cst_10 : f32 to vector<50x256xf32>
      %c0_11 = arith.constant 0 : index
      %c0_12 = arith.constant 0 : index
      %14 = vector.load %arg8[%c0_11, %c0_12] : memref<50x256xf32, #tpu.memory_space<vmem>>, vector<50x256xf32>
      tpu.vector_store %arg8[%c0_11, %c0_12], %13 {strides = array<i32>} : memref<50x256xf32, #tpu.memory_space<vmem>>, vector<50x256xf32>,
    } else {
    }
    %c0 = arith.constant 0 : index
    %c0_1 = arith.constant 0 : index
    %3 = vector.load %arg8[%c0, %c0_1] : memref<50x256xf32, #tpu.memory_space<vmem>>, vector<50x256xf32>
    %c0_2 = arith.constant 0 : index
    %c0_3 = arith.constant 0 : index
    %4 = vector.load %arg3[%c0_2, %c0_3] : memref<50x128xbf16, #tpu.memory_space<vmem>>, vector<50x128xbf16>
    %c0_4 = arith.constant 0 : index
    %c0_5 = arith.constant 0 : index
    %c0_6 = arith.constant 0 : index
    %5 = vector.load %arg2[%c0_4, %c0_5, %c0_6] : memref<1x128x256xbf16, #tpu.memory_space<vmem>>, vector<1x128x256xbf16>
    %6 = vector.shape_cast %5 : vector<1x128x256xbf16> to vector<128x256xbf16>
    %cst = arith.constant dense<0.000000e+00> : vector<50x256xf32>
    %7 = tpu.matmul %4, %6, %cst {dimension_numbers = #tpu.dot_dimension_numbers<[1], [0], [0], [1], [0, 0, 1, 1], [], []>} : vector<50x128xbf16>, vector<128x256xbf16>, vector<50x256xf32> -> vector<50x256xf32>
    %8 = arith.addf %3, %7 : vector<50x256xf32>
    %c0_7 = arith.constant 0 : index
    %c0_8 = arith.constant 0 : index
    %9 = vector.load %arg8[%c0_7, %c0_8] : memref<50x256xf32, #tpu.memory_space<vmem>>, vector<50x256xf32>
    tpu.vector_store %arg8[%c0_7, %c0_8], %8 {strides = array<i32>} : memref<50x256xf32, #tpu.memory_space<vmem>>, vector<50x256xf32>,
    %c1_i32 = arith.constant 1 : i32
    %10 = arith.cmpi eq, %arg1, %c1_i32 : i32
    %11 = arith.extui %10 : i1 to i32
    %c0_i32_9 = arith.constant 0 : i32
    %12 = arith.cmpi ne, %11, %c0_i32_9 : i32
    scf.if %12 {
      %cst_10 = arith.constant 0.000000e+00 : bf16
      %13 = vector.broadcast %cst_10 : bf16 to vector<50x512xbf16>
      %c0_11 = arith.constant 0 : index
      %c0_12 = arith.constant 0 : index
      %c0_13 = arith.constant 0 : index
      %14 = vector.load %arg7[%c0_11, %c0_12, %c0_13] : memref<1x50x512xbf16, #tpu.memory_space<vmem>>, vector<1x50x512xbf16>
      %15 = vector.shape_cast %14 : vector<1x50x512xbf16> to vector<50x512xbf16>
      %16 = vector.shape_cast %13 : vector<50x512xbf16> to vector<1x50x512xbf16>
      tpu.vector_store %arg7[%c0_11, %c0_12, %c0_13], %16 {strides = array<i32>} : memref<1x50x512xbf16, #tpu.memory_space<vmem>>, vector<1x50x512xbf16>,
      %c0_14 = arith.constant 0 : index
      %c0_15 = arith.constant 0 : index
      %17 = vector.load %arg8[%c0_14, %c0_15] : memref<50x256xf32, #tpu.memory_space<vmem>>, vector<1x256xf32>
      %18 = arith.truncf %17 : vector<1x256xf32> to vector<1x256xbf16>
      %c0_16 = arith.constant 0 : index
      %c0_17 = arith.constant 0 : index
      %c0_18 = arith.constant 0 : index
      %19 = vector.load %arg4[%c0_16, %c0_17, %c0_18] : memref<4x256x128xbf16, #tpu.memory_space<vmem>>, vector<1x256x128xbf16>
      %20 = vector.shape_cast %19 : vector<1x256x128xbf16> to vector<256x128xbf16>
      %cst_19 = arith.constant dense<0.000000e+00> : vector<1x128xf32>
      %21 = tpu.matmul %18, %20, %cst_19 {dimension_numbers = #tpu.dot_dimension_numbers<[1], [0], [0], [1], [0, 0, 1, 1], [], []>} : vector<1x256xbf16>, vector<256x128xbf16>, vector<1x128xf32> -> vector<1x128xf32>
      %c0_20 = arith.constant 0 : index
      %c0_21 = arith.constant 0 : index
      %c0_22 = arith.constant 0 : index
      %22 = vector.load %arg5[%c0_20, %c0_21, %c0_22] : memref<4x1x128xf32, #tpu.memory_space<vmem>>, vector<1x1x128xf32>
      %23 = vector.shape_cast %22 : vector<1x1x128xf32> to vector<1x128xf32>
      %24 = arith.mulf %21, %23 : vector<1x128xf32>
      %c0_23 = arith.constant 0 : index
      %c0_24 = arith.constant 0 : index
      %c0_25 = arith.constant 0 : index
      %25 = vector.load %arg6[%c0_23, %c0_24, %c0_25] : memref<4x1x128xf32, #tpu.memory_space<vmem>>, vector<1x1x128xf32>
      %26 = vector.shape_cast %25 : vector<1x1x128xf32> to vector<1x128xf32>
      %27 = arith.addf %24, %26 : vector<1x128xf32>
      %cst_26 = arith.constant 0.000000e+00 : f32
      %28 = vector.broadcast %cst_26 : f32 to vector<1x128xf32>
      %29 = arith.maximumf %27, %28 : vector<1x128xf32>
      %30 = arith.truncf %29 : vector<1x128xf32> to vector<1x128xbf16>
      %c0_27 = arith.constant 0 : index
      %c0_28 = arith.constant 0 : index
      %c0_29 = arith.constant 0 : index
      %31 = vector.load %arg7[%c0_27, %c0_28, %c0_29] : memref<1x50x512xbf16, #tpu.memory_space<vmem>>, vector<1x1x128xbf16>
      %32 = vector.shape_cast %31 : vector<1x1x128xbf16> to vector<1x128xbf16>
      %33 = vector.shape_cast %30 : vector<1x128xbf16> to vector<1x1x128xbf16>
      tpu.vector_store %arg7[%c0_27, %c0_28, %c0_29], %33 {strides = array<i32>} : memref<1x50x512xbf16, #tpu.memory_space<vmem>>, vector<1x1x128xbf16>,
      %c1 = arith.constant 1 : index
      %c0_30 = arith.constant 0 : index
      %34 = vector.load %arg8[%c1, %c0_30] : memref<50x256xf32, #tpu.memory_space<vmem>>, vector<4x256xf32>
      %35 = arith.truncf %34 : vector<4x256xf32> to vector<4x256xbf16>
      %c1_31 = arith.constant 1 : index
      %c0_32 = arith.constant 0 : index
      %c0_33 = arith.constant 0 : index
      %36 = vector.load %arg4[%c1_31, %c0_32, %c0_33] : memref<4x256x128xbf16, #tpu.memory_space<vmem>>, vector<1x256x128xbf16>
      %37 = vector.shape_cast %36 : vector<1x256x128xbf16> to vector<256x128xbf16>
      %cst_34 = arith.constant dense<0.000000e+00> : vector<4x128xf32>
      %38 = tpu.matmul %35, %37, %cst_34 {dimension_numbers = #tpu.dot_dimension_numbers<[1], [0], [0], [1], [0, 0, 1, 1], [], []>} : vector<4x256xbf16>, vector<256x128xbf16>, vector<4x128xf32> -> vector<4x128xf32>
      %c1_35 = arith.constant 1 : index
      %c0_36 = arith.constant 0 : index
      %c0_37 = arith.constant 0 : index
      %39 = vector.load %arg5[%c1_35, %c0_36, %c0_37] : memref<4x1x128xf32, #tpu.memory_space<vmem>>, vector<1x1x128xf32>
      %40 = vector.shape_cast %39 : vector<1x1x128xf32> to vector<1x128xf32>
      %41 = vector.broadcast %40 : vector<1x128xf32> to vector<4x128xf32>
      %42 = arith.mulf %38, %41 : vector<4x128xf32>
      %c1_38 = arith.constant 1 : index
      %c0_39 = arith.constant 0 : index
      %c0_40 = arith.constant 0 : index
      %43 = vector.load %arg6[%c1_38, %c0_39, %c0_40] : memref<4x1x128xf32, #tpu.memory_space<vmem>>, vector<1x1x128xf32>
      %44 = vector.shape_cast %43 : vector<1x1x128xf32> to vector<1x128xf32>
      %45 = vector.broadcast %44 : vector<1x128xf32> to vector<4x128xf32>
      %46 = arith.addf %42, %45 : vector<4x128xf32>
      %cst_41 = arith.constant 0.000000e+00 : f32
      %47 = vector.broadcast %cst_41 : f32 to vector<4x128xf32>
      %48 = arith.maximumf %46, %47 : vector<4x128xf32>
      %49 = arith.truncf %48 : vector<4x128xf32> to vector<4x128xbf16>
      %c0_42 = arith.constant 0 : index
      %c1_43 = arith.constant 1 : index
      %c128 = arith.constant 128 : index
      %50 = vector.load %arg7[%c0_42, %c1_43, %c128] : memref<1x50x512xbf16, #tpu.memory_space<vmem>>, vector<1x4x128xbf16>
      %51 = vector.shape_cast %50 : vector<1x4x128xbf16> to vector<4x128xbf16>
      %52 = vector.shape_cast %49 : vector<4x128xbf16> to vector<1x4x128xbf16>
      tpu.vector_store %arg7[%c0_42, %c1_43, %c128], %52 {strides = array<i32>} : memref<1x50x512xbf16, #tpu.memory_space<vmem>>, vector<1x4x128xbf16>,
      %c5 = arith.constant 5 : index
      %c0_44 = arith.constant 0 : index
      %53 = vector.load %arg8[%c5, %c0_44] : memref<50x256xf32, #tpu.memory_space<vmem>>, vector<9x256xf32>
      %54 = arith.truncf %53 : vector<9x256xf32> to vector<9x256xbf16>
      %c2 = arith.constant 2 : index
      %c0_45 = arith.constant 0 : index
      %c0_46 = arith.constant 0 : index
      %55 = vector.load %arg4[%c2, %c0_45, %c0_46] : memref<4x256x128xbf16, #tpu.memory_space<vmem>>, vector<1x256x128xbf16>
      %56 = vector.shape_cast %55 : vector<1x256x128xbf16> to vector<256x128xbf16>
      %cst_47 = arith.constant dense<0.000000e+00> : vector<9x128xf32>
      %57 = tpu.matmul %54, %56, %cst_47 {dimension_numbers = #tpu.dot_dimension_numbers<[1], [0], [0], [1], [0, 0, 1, 1], [], []>} : vector<9x256xbf16>, vector<256x128xbf16>, vector<9x128xf32> -> vector<9x128xf32>
      %c2_48 = arith.constant 2 : index
      %c0_49 = arith.constant 0 : index
      %c0_50 = arith.constant 0 : index
      %58 = vector.load %arg5[%c2_48, %c0_49, %c0_50] : memref<4x1x128xf32, #tpu.memory_space<vmem>>, vector<1x1x128xf32>
      %59 = vector.shape_cast %58 : vector<1x1x128xf32> to vector<1x128xf32>
      %60 = vector.broadcast %59 : vector<1x128xf32> to vector<9x128xf32>
      %61 = arith.mulf %57, %60 : vector<9x128xf32>
      %c2_51 = arith.constant 2 : index
      %c0_52 = arith.constant 0 : index
      %c0_53 = arith.constant 0 : index
      %62 = vector.load %arg6[%c2_51, %c0_52, %c0_53] : memref<4x1x128xf32, #tpu.memory_space<vmem>>, vector<1x1x128xf32>
      %63 = vector.shape_cast %62 : vector<1x1x128xf32> to vector<1x128xf32>
      %64 = vector.broadcast %63 : vector<1x128xf32> to vector<9x128xf32>
      %65 = arith.addf %61, %64 : vector<9x128xf32>
      %cst_54 = arith.constant 0.000000e+00 : f32
      %66 = vector.broadcast %cst_54 : f32 to vector<9x128xf32>
      %67 = arith.maximumf %65, %66 : vector<9x128xf32>
      %68 = arith.truncf %67 : vector<9x128xf32> to vector<9x128xbf16>
      %c0_55 = arith.constant 0 : index
      %c5_56 = arith.constant 5 : index
      %c256 = arith.constant 256 : index
      %69 = vector.load %arg7[%c0_55, %c5_56, %c256] : memref<1x50x512xbf16, #tpu.memory_space<vmem>>, vector<1x9x128xbf16>
      %70 = vector.shape_cast %69 : vector<1x9x128xbf16> to vector<9x128xbf16>
      %71 = vector.shape_cast %68 : vector<9x128xbf16> to vector<1x9x128xbf16>
      tpu.vector_store %arg7[%c0_55, %c5_56, %c256], %71 {strides = array<i32>} : memref<1x50x512xbf16, #tpu.memory_space<vmem>>, vector<1x9x128xbf16>,
      %c14 = arith.constant 14 : index
      %c0_57 = arith.constant 0 : index
      %72 = vector.load %arg8[%c14, %c0_57] : memref<50x256xf32, #tpu.memory_space<vmem>>, vector<36x256xf32>
      %73 = arith.truncf %72 : vector<36x256xf32> to vector<36x256xbf16>
      %c3 = arith.constant 3 : index
      %c0_58 = arith.constant 0 : index
      %c0_59 = arith.constant 0 : index
      %74 = vector.load %arg4[%c3, %c0_58, %c0_59] : memref<4x256x128xbf16, #tpu.memory_space<vmem>>, vector<1x256x128xbf16>
      %75 = vector.shape_cast %74 : vector<1x256x128xbf16> to vector<256x128xbf16>
      %cst_60 = arith.constant dense<0.000000e+00> : vector<36x128xf32>
      %76 = tpu.matmul %73, %75, %cst_60 {dimension_numbers = #tpu.dot_dimension_numbers<[1], [0], [0], [1], [0, 0, 1, 1], [], []>} : vector<36x256xbf16>, vector<256x128xbf16>, vector<36x128xf32> -> vector<36x128xf32>
      %c3_61 = arith.constant 3 : index
      %c0_62 = arith.constant 0 : index
      %c0_63 = arith.constant 0 : index
      %77 = vector.load %arg5[%c3_61, %c0_62, %c0_63] : memref<4x1x128xf32, #tpu.memory_space<vmem>>, vector<1x1x128xf32>
      %78 = vector.shape_cast %77 : vector<1x1x128xf32> to vector<1x128xf32>
      %79 = vector.broadcast %78 : vector<1x128xf32> to vector<36x128xf32>
      %80 = arith.mulf %76, %79 : vector<36x128xf32>
      %c3_64 = arith.constant 3 : index
      %c0_65 = arith.constant 0 : index
      %c0_66 = arith.constant 0 : index
      %81 = vector.load %arg6[%c3_64, %c0_65, %c0_66] : memref<4x1x128xf32, #tpu.memory_space<vmem>>, vector<1x1x128xf32>
      %82 = vector.shape_cast %81 : vector<1x1x128xf32> to vector<1x128xf32>
      %83 = vector.broadcast %82 : vector<1x128xf32> to vector<36x128xf32>
      %84 = arith.addf %80, %83 : vector<36x128xf32>
      %cst_67 = arith.constant 0.000000e+00 : f32
      %85 = vector.broadcast %cst_67 : f32 to vector<36x128xf32>
      %86 = arith.maximumf %84, %85 : vector<36x128xf32>
      %87 = arith.truncf %86 : vector<36x128xf32> to vector<36x128xbf16>
      %c0_68 = arith.constant 0 : index
      %c14_69 = arith.constant 14 : index
      %c384 = arith.constant 384 : index
      %88 = vector.load %arg7[%c0_68, %c14_69, %c384] : memref<1x50x512xbf16, #tpu.memory_space<vmem>>, vector<1x36x128xbf16>
      %89 = vector.shape_cast %88 : vector<1x36x128xbf16> to vector<36x128xbf16>
      %90 = vector.shape_cast %87 : vector<36x128xbf16> to vector<1x36x128xbf16>
      tpu.vector_store %arg7[%c0_68, %c14_69, %c384], %90 {strides = array<i32>} : memref<1x50x512xbf16, #tpu.memory_space<vmem>>, vector<1x36x128xbf16>,
    } else {
    }
    return
  }
  func.func @transform_0(%arg0: i32, %arg1: i32) -> (i32, i32, i32) {
    %c0_i32 = arith.constant 0 : i32
    %c0_i32_0 = arith.constant 0 : i32
    return %arg0, %arg1, %c0_i32 : i32, i32, i32
  }
  func.func @transform_1(%arg0: i32, %arg1: i32) -> (i32, i32) {
    %c0_i32 = arith.constant 0 : i32
    %c0_i32_0 = arith.constant 0 : i32
    return %c0_i32, %arg1 : i32, i32
  }
  func.func @transform_2(%arg0: i32, %arg1: i32) -> (i32, i32, i32) {
    %c0_i32 = arith.constant 0 : i32
    %c0_i32_0 = arith.constant 0 : i32
    %c0_i32_1 = arith.constant 0 : i32
    %c0_i32_2 = arith.constant 0 : i32
    return %c0_i32, %c0_i32_0, %c0_i32_1 : i32, i32, i32
  }
  func.func @transform_3(%arg0: i32, %arg1: i32) -> (i32, i32, i32) {
    %c0_i32 = arith.constant 0 : i32
    %c0_i32_0 = arith.constant 0 : i32
    %c0_i32_1 = arith.constant 0 : i32
    %c0_i32_2 = arith.constant 0 : i32
    return %c0_i32, %c0_i32_0, %c0_i32_1 : i32, i32, i32
  }
  func.func @transform_4(%arg0: i32, %arg1: i32) -> (i32, i32, i32) {
    %c0_i32 = arith.constant 0 : i32
    %c0_i32_0 = arith.constant 0 : i32
    %c0_i32_1 = arith.constant 0 : i32
    %c0_i32_2 = arith.constant 0 : i32
    return %c0_i32, %c0_i32_0, %c0_i32_1 : i32, i32, i32
  }
  func.func @transform_5(%arg0: i32, %arg1: i32) -> (i32, i32, i32) {
    %c0_i32 = arith.constant 0 : i32
    %c0_i32_0 = arith.constant 0 : i32
    %c0_i32_1 = arith.constant 0 : i32
    return %arg0, %c0_i32, %c0_i32_0 : i32, i32, i32
  }
}

</mosaic_0001>

<bundles_post_ra>
// kernel: tpu_custom_call.1
= control target key start
LH: loop header
LB: loop body
LE: loop exit
PB: predicated region body
PF: predicated region fallthrough
CT: control target
= control target key end

     0   :  { %s2770_s0 = inlined_call_operand.hbm [shape: bf16[2,256,256], index: 0, kind: input, shape index: {}]   ;;  %s2771_s1 = inlined_call_operand.hbm [shape: bf16[50,256], index: 1, kind: input, shape index: {}]   ;;  %s2772_s2 = inlined_call_operand.hbm [shape: bf16[4,256,128], index: 2, kind: input, shape index: {}]   ;;  %s2773_s3 = inlined_call_operand.vmem [shape: f32[4,1,128], index: 3, kind: input, shape index: {}]   ;;  %s2774_s4 = inlined_call_operand.vmem [shape: f32[4,1,128], index: 4, kind: input, shape index: {}]   ;;  %s2775_s5 = inlined_call_operand.vmem [shape: bf16[2,50,512], index: 5, kind: output, shape index: {}]  }
   0x1   :  { %2789 = sst [smem:[#allocation16_spill]] %s2772_s2 }
   0x2   :  { %2790 = sst [smem:[#allocation17_spill]] %s2773_s3 }
   0x3   :  { %2791 = sst [smem:[#allocation18_spill]] %s2774_s4 }
   0x4   :  { %2792 = sst [smem:[#allocation19_spill]] %s2775_s5 }
   0x5   :  { %10 = vsyncpa [#allocation4], 0 }
   0x6   :  { %12 = vsyncpa [#allocation4 + $0x1], 0 }
   0x7   :  { %13 = vsyncpa [#allocation6], 0 }
   0x8   :  { %15 = vsyncpa [#allocation6 + $0x1], 0  ;;  %s2362_s18 = smov 0   ;;  %s2364_s19 = smov 0  }
   0x9   :  { %s2366_s20 = smov 0   ;;  %s2368_s21 = smov 0  }
   0xa   :  { %s2370_s22 = smov 0   ;;  %s2372_s23 = smov 0  }
   0xb   :  { %s2374_s24 = smov 0   ;;  %s2376_s25 = smov 0  }
   0xc   :  { %s2378_s26 = smov 0   ;;  %s2380_s27 = smov 0  }
   0xd   :  { %s2382_s28 = smov 0  }
   0xe LB: > { %2793 = sst [smem:[#allocation11_spill]] %s2304_s24  ;;  %s2781_s29 = sadd.s32 4294967295, %s2320_s28   ;;  %s2320_s28 = sphi %s2382_s28, %s21_s28   ;;  %s2316_s27 = sphi %s2380_s27, %s2836_s27   ;;  %s2312_s26 = sphi %s2378_s26, %s2835_s26   ;;  %s2308_s25 = sphi %s2376_s25, %s2834_s25   ;;  %s2304_s24 = sphi %s2374_s24, %s2833_s24   ;;  %s2300_s23 = sphi %s2372_s23, %s2832_s23   ;;  %s2296_s22 = sphi %s2370_s22, %s2831_s22   ;;  %s2292_s21 = sphi %s2368_s21, %s2830_s21   ;;  %s2288_s20 = sphi %s2366_s20, %s2829_s20   ;;  %s2284_s19 = sphi %s2364_s19, %s2828_s19   ;;  %s2280_s18 = sphi %s2362_s18, %s2827_s18  }
   0xf   : > { %2794 = sst [smem:[#allocation12_spill]] %s2308_s25  ;;  %p55_p0 = scmp.ne.s32.totalorder %s2296_s22, %s2292_s21 }
  0x10   : > { %p2417_p1 = scmp.eq.s32.totalorder %s2781_s29, 0  ;;  %p81_p3 = scmp.ne.s32.totalorder %s2284_s19, %s2280_s18 }
  0x11   : > { %p1675_p4 = scmp.ge.s32.totalorder %s2320_s28, 1  ;;  %p181_p6 = scmp.lt.s32.totalorder %s2320_s28, 5 }
  0x12   : > { %s2795_s30 = scalar_select %p2417_p1, 1, 0 }
  0x13   : > { %p2427_p5 = por %p2417_p1, %p55_p0  ;;  %p2434_p7 = por %p81_p3, %p2417_p1 }
  0x14   : > { %p2438_p8 = pnand %p1675_p4, %p181_p6  ;;  %s2322_s9 = smov [#allocation7]  }
  0x15   : > { %s2796_s6 = scalar_select %p2427_p5, 1, 0 }
  0x16   : > { %s2797_s7 = scalar_select %p2434_p7, 1, 0 }
  0x17   : > { %s2798_s8 = scalar_select %p2438_p8, 1, 0 }
  0x18   : > { %s193_s10 = sshll.u32 %s2322_s9, 4  ;;  %p1932_p9 = pneg %p2438_p8  ;;  %s194_s10 = int_to_ptr.vmem [resolvable:$true] %s193_s10 }
  0x19   : > { %s2800_s2 = sld [smem:[#allocation16_spill]] }
  0x1a   : > { %p2446_p10 = pnand %p1932_p9, %p2417_p1 }
  0x1c   : > { %p2136_p12 = pneg %p2446_p10 }
  0x1f   : > { %s2134_s14 = scalar_lea.hbm %s2800_s2, 8192 }
  0x20   : > { %p2135_p11 = scmp.ne.s32.totalorder %s2800_s2, %s2134_s14  ;;  %p2141_p3 = scmp.lt.u32.totalorder %s2134_s14, %s2800_s2 }
  0x22   : > { %p2137_p13 = pnand %p2136_p12, %p2135_p11 }
  0x24   : > { %p2138_p0 = pneg %p2137_p13 }
  0x26   : > { %p2143_p4 = pnand %p2141_p3, %p2138_p0 }
  0x28   : > { %2146 = shalt.err (!%p2143_p4)
}
  0x29   : > { %s2147_s21 = scalar_lea.vmem %s194_s10, 8192  ;;  %p2155_p1 = scmp.lt.s32.totalorder %s194_s10, %s194_s10 }
  0x2a   : > { %p2148_p6 = scmp.ne.s32.totalorder %s194_s10, %s2147_s21  ;;  %p2156_p7 = scmp.lt.s32.totalorder %s2147_s21, %s2147_s21 }
  0x2c   : > { %p2150_p9 = pnand %p2148_p6, %p2136_p12  ;;  %p2157_p5 = por %p2156_p7, %p2155_p1 }
  0x2e   : > { %p2151_p2 = pneg %p2150_p9 }
  0x30   : > { %p2158_p8 = pnand %p2157_p5, %p2151_p2 }
  0x32   : > { %2161 = shalt.err (!%p2158_p8)
}
  0x33   : > { %s2782_s9 = smov 64   ;;  %s2783_s12 = smov 4  }
  0x34   : > { %1935 = dma.hbm_to_vmem [thread:$0]  (!%p2446_p10), %s2800_s2, 8192, %s194_s10, [#allocation6], %s2782_s9, %s2782_s9, %s2783_s12  }
  0x35   : > { %s30_s15 = sadd.s32 1, %s2312_s26  ;;  %s33_s16 = sadd.s32 1, %s2316_s27 }
  0x36   : > { %p31_p1 = scmp.ge.s32.totalorder %s30_s15, 2  ;;  %s42_s17 = sadd.s32 1, %s2300_s23 }
  0x37   : > { %p49_p2 = scmp.ne.s32.totalorder %s2300_s23, %s2296_s22  ;;  %p50_p5 = scmp.eq.s32.totalorder %s2320_s28, 0 }
  0x38   : > { %s2838_s15 = smov (%p31_p1, %s30_s15), 0  ;;  %s2840_s16 = smov (!%p31_p1, %s33_s16), %s2316_s27 }
  0x39   : > { %2801 = sst [smem:[#allocation13_spill]] %s2838_s15  ;;  %s38_s11 = ssub.s32 %s2312_s26, %s2838_s15 }
  0x3a   : > { %p2480_p7 = por %p50_p5, %p49_p2  ;;  %p35_p8 = scmp.ge.s32.totalorder %s2840_s16, 2 }
  0x3b   : > { %p66_p10 = scmp.eq.s32.totalorder %s38_s11, 0  ;;  %s68_s18 = sadd.s32 1, %s2288_s20 }
  0x3c   : > { %p2803_p11 = scmp.ne.s32.totalorder %s2288_s20, %s2284_s19  ;;  %s2842_s16 = smov (%p35_p8, %s2840_s16), 0 }
  0x3d   : > { %2805 = sst [smem:[#allocation14_spill]] %s2842_s16  ;;  %s37_s14 = ssub.s32 %s2316_s27, %s2842_s16 }
  0x3e   : > { %p2488_p12 = por %p2803_p11, %p50_p5  ;;  %p1944_p13 = scmp.lt.s32.totalorder %s2320_s28, 4 }
  0x3f   : > { %s2495_s13 = scalar_select %p66_p10, %s2288_s20, %s68_s18  }
  0x40   : > { %s39_s29 = sor.u32 %s38_s11, %s37_s14  ;;  %s213_s9 = sand.u32 1, %s2300_s23  }
  0x41   : > { %2806 = sst [smem:[#allocation15_spill]] %s2495_s13  ;;  %p40_p0 = scmp.eq.s32.totalorder %s39_s29, 0 }
  0x42   : > { %s1678_s12 = sshll.u32 %s213_s9, 7  ;;  %s1796_s2 = sshll.u32 %s2312_s26, 5 }
  0x43   : > { %s2503_s15 = scalar_select %p40_p0, %s2300_s23, %s42_s17  }
  0x44   : > { %s1681_s4 = sshll.u32 %s2316_s27, 6  ;;  %s217_s24 = scalar_lea.vmem [#allocation3], %s1678_s12 }
  0x45   : > { %s224_s3 = sadd.s32 %s1796_s2, %s1681_s4  ;;  %s227_s5 = sshll.u32 %s217_s24, 4  ;;  %s2506_s5 = int_to_ptr.vmem [resolvable:$true] %s227_s5 }
  0x46   : > { %s1682_s25 = sshll.u32 %s224_s3, 6  ;;  %p2517_p3 = pnand %p1944_p13, %p2480_p7 }
  0x47   : > { %s2511_s16 = scalar_lea.hbm %s2770_s0, %s1682_s25  ;;  %p2525_p4 = pnand %p1944_p13, %p2488_p12 }
  0x48   : > { %s2529_s3 = scalar_lea.sflag [#allocation4], %s213_s9  ;;  %s2162_s4 = scalar_lea.hbm %s2511_s16, 2048 }
  0x49   : > { %p2163_p6 = scmp.ne.s32.totalorder %s2511_s16, %s2162_s4  ;;  %p2164_p9 = pneg %p2517_p3 }
  0x4a   : > { %s2167_s12 = scalar_lea.hbm %s2770_s0, 8192  ;;  %p2168_p5 = scmp.lt.u32.totalorder %s2511_s16, %s2770_s0 }
  0x4b   : > { %p2165_p1 = pnand %p2164_p9, %p2163_p6  ;;  %p2169_p7 = scmp.lt.u32.totalorder %s2167_s12, %s2162_s4 }
  0x4c   : > { %p2171_p10 = scmp.lt.u32.totalorder %s2162_s4, %s2511_s16 }
  0x4d   : > { %p2166_p2 = pneg %p2165_p1  ;;  %p2170_p8 = por %p2169_p7, %p2168_p5 }
  0x4f   : > { %p2172_p11 = por %p2171_p10, %p2170_p8 }
  0x51   : > { %p2173_p12 = pnand %p2172_p11, %p2166_p2 }
  0x53   : > { %2176 = shalt.err (!%p2173_p12)
}
  0x54   : > { %s2177_s9 = scalar_lea.vmem %s2506_s5, 2048  ;;  %s2325_s10 = smov [#allocation3]  }
  0x55   : > { %p2178_p13 = scmp.ne.s32.totalorder %s2506_s5, %s2177_s9  ;;  %s2182_s21 = sshll.u32 %s2325_s10, 4  ;;  %s2183_s21 = int_to_ptr.vmem [resolvable:$false] %s2182_s21 }
  0x56   : > { %s2184_s13 = scalar_lea.vmem %s2183_s21, 4096  ;;  %p2185_p1 = scmp.lt.s32.totalorder %s2506_s5, %s2183_s21 }
  0x57   : > { %p2180_p0 = pnand %p2178_p13, %p2164_p9  ;;  %p2186_p5 = scmp.lt.s32.totalorder %s2184_s13, %s2177_s9 }
  0x59   : > { %p2181_p6 = pneg %p2180_p0  ;;  %p2187_p7 = por %p2186_p5, %p2185_p1 }
  0x5b   : > { %p2188_p8 = pnand %p2187_p7, %p2181_p6 }
  0x5d   : > { %2191 = shalt.err (!%p2188_p8)
}
  0x5e   : > { %s2326_s14 = smov 128   ;;  %s2327_s18 = smov 8  }
  0x5f   : > { %1939 = dma.hbm_to_vmem [thread:$0]  (!%p2517_p3), %s2511_s16, 2048, %s2506_s5, %s2529_s3, %s2326_s14, %s2326_s14, %s2327_s18  }
  0x60   : > { %s237_s4 = sand.u32 1, %s2320_s28   ;;  %s239_s24 = sand.u32 1, %s2288_s20  }
  0x61   : > { %s1921_s25 = smul.u32 28, %s239_s24  ;;  %s1683_s12 = sshll.u32 %s2312_s26, 6 }
  0x62   : > { %s2565_s9 = scalar_lea.hbm %s2771_s1, %s1683_s12  ;;  %s2569_s29 = scalar_lea.sflag [#allocation6], %s237_s4 }
  0x63   : > { %s241_s10 = scalar_lea.vmem [#allocation5], %s1921_s25  ;;  %s2192_s5 = scalar_lea.hbm %s2565_s9, 448 }
  0x64   : > { %s247_s21 = sshll.u32 %s241_s10, 4  ;;  %p2193_p3 = scmp.ne.s32.totalorder %s2565_s9, %s2192_s5  ;;  %s2567_s21 = int_to_ptr.vmem [resolvable:$true] %s247_s21 }
  0x65   : > { %p2194_p9 = pneg %p2525_p4  ;;  %s2197_s13 = scalar_lea.hbm %s2771_s1, 896 }
  0x66   : > { %p2198_p11 = scmp.lt.u32.totalorder %s2565_s9, %s2771_s1  ;;  %p2199_p12 = scmp.lt.u32.totalorder %s2197_s13, %s2192_s5 }
  0x67   : > { %p2195_p2 = pnand %p2194_p9, %p2193_p3  ;;  %p2201_p0 = scmp.lt.u32.totalorder %s2192_s5, %s2565_s9 }
  0x68   : > { %p2200_p13 = por %p2199_p12, %p2198_p11 }
  0x69   : > { %p2196_p10 = pneg %p2195_p2 }
  0x6a   : > { %p2202_p6 = por %p2201_p0, %p2200_p13 }
  0x6c   : > { %p2203_p1 = pnand %p2202_p6, %p2196_p10 }
  0x6e   : > { %2206 = shalt.err (!%p2203_p1)
}
  0x6f   : > { %s2207_s4 = scalar_lea.vmem %s2567_s21, 448  ;;  %s2328_s25 = smov [#allocation5]  }
  0x70   : > { %p2208_p5 = scmp.ne.s32.totalorder %s2567_s21, %s2207_s4  ;;  %s2212_s12 = sshll.u32 %s2328_s25, 4  ;;  %s2213_s12 = int_to_ptr.vmem [resolvable:$false] %s2212_s12 }
  0x71   : > { %s2214_s17 = scalar_lea.vmem %s2213_s12, 896  ;;  %p2215_p3 = scmp.lt.s32.totalorder %s2567_s21, %s2213_s12 }
  0x72   : > { %p2210_p7 = pnand %p2208_p5, %p2194_p9  ;;  %p2216_p2 = scmp.lt.s32.totalorder %s2214_s17, %s2207_s4 }
  0x74   : > { %p2211_p8 = pneg %p2210_p7  ;;  %p2217_p11 = por %p2216_p2, %p2215_p3 }
  0x76   : > { %p2218_p12 = pnand %p2217_p11, %p2211_p8 }
  0x78   : > { %2221 = shalt.err (!%p2218_p12)
}
  0x79   : > { %s2809_s11 = smov 4   ;;  %s2810_s10 = smov 64  }
  0x7a   : > { %1942 = dma.hbm_to_vmem [thread:$0]  (!%p2525_p4), %s2565_s9, 448, %s2567_s21, %s2569_s29, %s2326_s14, %s2810_s10, %s2809_s11  }
  0x7b   : > { %p2811_p9 = scmp.ne.s32.totalorder %s2798_s8, 0 }
  0x7c   : > { %s261_s5 = sand.u32 (!%p2811_p9), 1, %s2296_s22   ;;  %p2812_p10 = scmp.ne.s32.totalorder (!%p2811_p9), %s2796_s6, 0 }
  0x7d   : > { %259 = sbr.rel (%p2811_p9) target bundleno = 701 (0x2bd), region = 40  ;;  %s1685_s16 = sshll.u32 (!%p2811_p9), %s261_s5, 7 }
  0x7e   : > { %s262_s3 = scalar_lea.sflag (!%p2811_p9), [#allocation4], %s261_s5  ;;  %s2603_s13 = scalar_lea.vmem (!%p2811_p9), [#allocation3], %s1685_s16 }
  0x84   : > { %2267 = dma.done.wait (%p2812_p10), %s262_s3, 2048  }
  0x85   : > { %2269 = vsyncadd (%p2812_p10), %s262_s3, 4294965248  ;;  %s2813_s2 = sadd.s32 4294967295, %s2320_s28   ;;  %s272_s9 = sand.u32 1, %s2284_s19  }
  0x86   : > { %s270_s14 = sand.u32 1, %s2813_s2   ;;  %s1922_s8 = smul.u32 28, %s272_s9 }
  0x87   : > { %s271_s21 = scalar_lea.sflag [#allocation6], %s270_s14  ;;  %p2814_p4 = scmp.ne.s32.totalorder %s2797_s7, 0 }
  0x88   : > { %s2612_s29 = scalar_lea.vmem [#allocation5], %s1922_s8 }
  0x89   : > { %2271 = dma.done.wait (%p2814_p4), %s271_s21, 448  }
  0x8a   : > { %2273 = vsyncadd (%p2814_p4), %s271_s21, 4294966848  ;;  %p2815_p13 = scmp.ne.s32.totalorder %s2795_s30, 0 }
  0x8c   : > { %2275 = dma.done.wait (%p2815_p13), [#allocation6], 8192  }
  0x8d   : > { %2277 = vsyncadd (%p2815_p13), [#allocation6], 4294959104  ;;  %s2816_s6 = sld [smem:[#allocation12_spill]]  ;;  %s2817_s25 = sld [smem:[#allocation19_spill]] }
  0x8e   : > { %s2818_s17 = sld [smem:[#allocation11_spill]] }
  0x93   : > { %p311_p0 = scmp.lt.s32.totalorder %s2816_s6, 1 }
  0x94   : > { %p1688_p6 = scmp.ne.s32.totalorder %s2818_s17, 0 }
  0x95   : > { %s2844_s6 = smov (!%p311_p0, %s2816_s6), 1  ;;  %v2329_v0 = vmov (!%p1688_p6), 0.0  }
  0x96   : > { %s1923_s18 = smul.u32 112, %s2844_s6  ;;  %321 = vst [vmem:[#allocation2] sm:$0xff] (!%p1688_p6), %v2329_v0  ;;  %322 = vst [vmem:[#allocation2 + $0x8] sm:$0xff] (!%p1688_p6), %v2329_v0 }
  0x97   : > { %320 = sbr.rel (%p1688_p6) target bundleno = 158 (0x9e), region = 56  ;;  %323 = vst [vmem:[#allocation2 + $0x10] sm:$0xff] (!%p1688_p6), %v2329_v0  ;;  %324 = vst [vmem:[#allocation2 + $0x18] sm:$0xff] (!%p1688_p6), %v2329_v0 }
  0x98   : > { %s2627_s12 = scalar_lea.vmem %s2817_s25, %s1923_s18  ;;  %325 = vst [vmem:[#allocation2 + $0x20] sm:$0xff] (!%p1688_p6), %v2329_v0  ;;  %326 = vst [vmem:[#allocation2 + $0x28] sm:$0xff] (!%p1688_p6), %v2329_v0 }
  0x99   : > { %327 = vst [vmem:[#allocation2 + $0x30] sm:$0xff] (!%p1688_p6), %v2329_v0  ;;  %328 = vst [vmem:[#allocation2 + $0x38] sm:$0xff] (!%p1688_p6), %v2329_v0 }
  0x9a   : > { %329 = vst [vmem:[#allocation2 + $0x40] sm:$0xff] (!%p1688_p6), %v2329_v0  ;;  %330 = vst [vmem:[#allocation2 + $0x48] sm:$0xff] (!%p1688_p6), %v2329_v0 }
  0x9b   : > { %331 = vst [vmem:[#allocation2 + $0x50] sm:$0xff] (!%p1688_p6), %v2329_v0  ;;  %332 = vst [vmem:[#allocation2 + $0x58] sm:$0xff] (!%p1688_p6), %v2329_v0 }
  0x9c   : > { %333 = vst [vmem:[#allocation2 + $0x60] sm:$0x3] (!%p1688_p6), %v2329_v0  ;;  %334 = vst [vmem:[#allocation2 + $0x68] sm:$0x3] (!%p1688_p6), %v2329_v0 }
  0x9e PF: > { %v2042_v1 = vld [vmem:[%s2603_s13 + $0x4] ss:$8 sps:$4 sm:$0xff]   ;;  %v2044_v2 = vld [vmem:[%s2603_s13] ss:$8 sps:$4 sm:$0xff]   ;;  %v2330_v3 = vmov 0   ;;  %v335_v22 = vld [vmem:[#allocation2] sm:$0xff] }
  0x9f   : > { %506 = vmatprep.mubr.bf16.mxu0 %v2330_v3  ;;  %526 = vmatprep.mubr.bf16.mxu1 %v2330_v3  ;;  %v2045_v4 = vld [vmem:[%s2603_s13 + $0x14] ss:$8 sps:$4 sm:$0xff]   ;;  %v2047_v5 = vld [vmem:[%s2603_s13 + $0x10] ss:$8 sps:$4 sm:$0xff]   ;;  %v2048_v6 = vld [vmem:[%s2603_s13 + $0x24] ss:$8 sps:$4 sm:$0xff]  }
  0xa0   : > { %474 = vmatprep.subr.bf16.mxu0 %v2042_v1  ;;  %1905 = vmatprep.subr.bf16.mxu1 %v2042_v1  ;;  %v2050_v7 = vld [vmem:[%s2603_s13 + $0x20] ss:$8 sps:$4 sm:$0xff]   ;;  %v2051_v8 = vld [vmem:[%s2603_s13 + $0x34] ss:$8 sps:$4 sm:$0xff]   ;;  %v2053_v9 = vld [vmem:[%s2603_s13 + $0x30] ss:$8 sps:$4 sm:$0xff]  }
  0xa1   : > { %475 = vmatpush1.bf16.msra.mxu0 %v2044_v2  ;;  %1913 = vmatpush1.bf16.msra.mxu1 %v2044_v2  ;;  %v2054_v10 = vld [vmem:[%s2603_s13 + $0x44] ss:$8 sps:$4 sm:$0xff]   ;;  %v2056_v11 = vld [vmem:[%s2603_s13 + $0x40] ss:$8 sps:$4 sm:$0xff]   ;;  %v2057_v12 = vld [vmem:[%s2603_s13 + $0x54] ss:$8 sps:$4 sm:$0xff]  }
  0xa2   : > { %476 = vmatprep.subr.bf16.mxu0 %v2045_v4  ;;  %1906 = vmatprep.subr.bf16.mxu1 %v2045_v4  ;;  %v2059_v13 = vld [vmem:[%s2603_s13 + $0x50] ss:$8 sps:$4 sm:$0xff]   ;;  %v2060_v14 = vld [vmem:[%s2603_s13 + $0x64] ss:$8 sps:$4 sm:$0xff]   ;;  %v2062_v15 = vld [vmem:[%s2603_s13 + $0x60] ss:$8 sps:$4 sm:$0xff]  }
  0xa3   : > { %v2063_v16 = vld [vmem:[%s2603_s13 + $0x74] ss:$8 sps:$4 sm:$0xff]   ;;  %v2065_v17 = vld [vmem:[%s2603_s13 + $0x70] ss:$8 sps:$4 sm:$0xff]   ;;  %v2068_v20 = vld [vmem:[%s2612_s29 + $0x8] sm:$0xff]   ;;  %s2819_s30 = sld [smem:[#allocation11_spill]] }
  0xa4   : > { %v2066_v18 = vld [vmem:[%s2612_s29] sm:$0xff]   ;;  %v2067_v19 = vld [vmem:[%s2612_s29 + $0x10] sm:$0xff]   ;;  %v2069_v21 = vld [vmem:[%s2612_s29 + $0x18] ss:$0 sps:$4 sm:$0x11]  }
  0xa5   : > { %477 = vmatpush1.bf16.msra.mxu0 %v2047_v5  ;;  %1914 = vmatpush1.bf16.msra.mxu1 %v2047_v5  ;;  %v343_v23 = vld [vmem:[#allocation2 + $0x40] sm:$0xff]  ;;  %v336_v24 = vld [vmem:[#allocation2 + $0x8] sm:$0xff]  ;;  %v337_v28 = vld [vmem:[#allocation2 + $0x10] sm:$0xff] }
  0xa6   : > { %478 = vmatprep.subr.bf16.mxu0 %v2048_v6  ;;  %1907 = vmatprep.subr.bf16.mxu1 %v2048_v6  ;;  %v344_v25 = vld [vmem:[#allocation2 + $0x48] sm:$0xff]  ;;  %v345_v29 = vld [vmem:[#allocation2 + $0x50] sm:$0xff]  ;;  %v338_v34 = vld [vmem:[#allocation2 + $0x18] sm:$0xff] }
  0xa7   : > { %v346_v35 = vld [vmem:[#allocation2 + $0x58] sm:$0xff]  ;;  %v339_v46 = vld [vmem:[#allocation2 + $0x20] sm:$0xff]  ;;  %v340_v48 = vld [vmem:[#allocation2 + $0x28] sm:$0xff] }
  0xa8   : > { %v347_v47 = vld [vmem:[#allocation2 + $0x60] sm:$0x3]  ;;  %v348_v49 = vld [vmem:[#allocation2 + $0x68] sm:$0x3]  ;;  %v341_v52 = vld [vmem:[#allocation2 + $0x30] sm:$0xff] }
  0xa9   : > { %479 = vmatpush1.bf16.msra.mxu0 %v2050_v7  ;;  %1915 = vmatpush1.bf16.msra.mxu1 %v2050_v7  ;;  %v342_v57 = vld [vmem:[#allocation2 + $0x38] sm:$0xff]  ;;  %p1709_p1 = scmp.ne.s32.totalorder %s2819_s30, 1 }
  0xaa   : > { %480 = vmatprep.subr.bf16.mxu0 %v2051_v8  ;;  %1908 = vmatprep.subr.bf16.mxu1 %v2051_v8  ;;  %v2070_v2 = vld [vmem:[#allocation7 + $0xc0] sm:$0xff] (!%p1709_p1)   ;;  %v2072_v4 = vld [vmem:[#allocation7 + $0xc8] sm:$0xff] (!%p1709_p1)   ;;  %v2076_v8 = vld [vmem:[#allocation7 + $0xd0] sm:$0xff] (!%p1709_p1)   ;;  %vm1316_vm0 = vcmask (!%p1709_p1), 1044480   ;;  %s2820_s10 = sld [smem:[#allocation17_spill]] (!%p1709_p1)  ;;  %s2821_s3 = sld [smem:[#allocation18_spill]] (!%p1709_p1) }
  0xab   : > { %v2073_v5 = vld [vmem:[#allocation7 + $0x88] sm:$0xff] (!%p1709_p1)   ;;  %v2074_v6 = vld [vmem:[#allocation7 + $0x40] sm:$0xff] (!%p1709_p1)   ;;  %vm779_vm1 = vcmask (!%p1709_p1), 1040384   ;;  %vm780_vm2 = vsmask.f32 (!%p1709_p1), 256  ;;  %vm1005_vm3 = vcmask (!%p1709_p1), 1042432  }
  0xac   : > { %v2075_v7 = vld [vmem:[#allocation7] sm:$0xff] (!%p1709_p1)   ;;  %vm1006_vm4 = vsmask.f32 (!%p1709_p1), 2306  ;;  %vm781_vm5 = vmand (!%p1709_p1), %vm779_vm1, %vm780_vm2  ;;  %vm1532_vm7 = vcmask (!%p1709_p1), 1046532   ;;  %vm1252_vm9 = vcmask (!%p1709_p1), 1043458  }
  0xad   : > { %481 = vmatpush1.bf16.msra.mxu0 %v2053_v9  ;;  %1916 = vmatpush1.bf16.msra.mxu1 %v2053_v9  ;;  %v2077_v9 = vld [vmem:[#allocation7 + $0x90] sm:$0xff] (!%p1709_p1)   ;;  %vm1007_vm6 = vmand (!%p1709_p1), %vm1005_vm3, %vm1006_vm4  ;;  %vm1253_vm10 = vsmask.f32 (!%p1709_p1), 7946  ;;  %vm1233_vm11 = vsmask.f32 (!%p1709_p1), 2304 }
  0xae   : > { %482 = vmatprep.subr.bf16.mxu0 %v2054_v10  ;;  %1909 = vmatprep.subr.bf16.mxu1 %v2054_v10  ;;  %v2078_v10 = vld [vmem:[#allocation7 + $0x48] sm:$0xff] (!%p1709_p1)   ;;  %vm2708_vm8 = vmor (!%p1709_p1), %vm1005_vm3, %vm1532_vm7  ;;  %vm1234_vm12 = vsmask.f32 (!%p1709_p1), 6416 }
  0xaf   : > { %vm1254_vm13 = vmand (!%p1709_p1), %vm1252_vm9, %vm1253_vm10 }
  0xb0   : > { %vm1235_vm14 = vmor (!%p1709_p1), %vm1233_vm11, %vm1234_vm12 }
  0xb1   : > { %483 = vmatpush1.bf16.msra.mxu0 %v2056_v11  ;;  %1917 = vmatpush1.bf16.msra.mxu1 %v2056_v11  ;;  %v2079_v11 = vld [vmem:[#allocation7 + $0x8] sm:$0xff] (!%p1709_p1)  }
  0xb2   : > { %484 = vmatprep.subr.bf16.mxu0 %v2057_v12  ;;  %1910 = vmatprep.subr.bf16.mxu1 %v2057_v12  ;;  %v2080_v12 = vld [vmem:[#allocation7 + $0xd8] sm:$0xff] (!%p1709_p1)  }
  0xb5   : > { %485 = vmatpush1.bf16.msra.mxu0 %v2059_v13  ;;  %1918 = vmatpush1.bf16.msra.mxu1 %v2059_v13  ;;  %v2081_v13 = vld [vmem:[#allocation7 + $0x98] sm:$0xff] (!%p1709_p1)  }
  0xb6   : > { %486 = vmatprep.subr.bf16.mxu0 %v2060_v14  ;;  %1911 = vmatprep.subr.bf16.mxu1 %v2060_v14  ;;  %v2082_v14 = vld [vmem:[#allocation7 + $0x50] sm:$0xff] (!%p1709_p1)  }
  0xb9   : > { %487 = vmatpush1.bf16.msra.mxu0 %v2062_v15  ;;  %1919 = vmatpush1.bf16.msra.mxu1 %v2062_v15  ;;  %v2083_v15 = vld [vmem:[#allocation7 + $0x10] sm:$0xff] (!%p1709_p1)  }
  0xba   : > { %488 = vmatprep.subr.bf16.mxu0 %v2063_v16  ;;  %1912 = vmatprep.subr.bf16.mxu1 %v2063_v16  ;;  %v2084_v16 = vld [vmem:[#allocation7 + $0xe0] sm:$0xff] (!%p1709_p1)  }
  0xbd   : > { %489 = vmatpush1.bf16.msra.mxu0 %v2065_v17  ;;  %1920 = vmatpush1.bf16.msra.mxu1 %v2065_v17  ;;  %v2085_v17 = vld [vmem:[#allocation7 + $0xa0] sm:$0xff] (!%p1709_p1)  }
  0xbe   : > { %1827 = vmatprep.subr.bf16.mxu1 (!%p1709_p1), %v2070_v2  ;;  %1805 = vmatprep.subr.bf16.mxu0 (!%p1709_p1), %v2074_v6  ;;  %v2114_v2 = vld [vmem:[#allocation7 + $0x150] sm:$0xff] (!%p1709_p1)   ;;  %v2118_v6 = vld [vmem:[#allocation7 + $0x158] sm:$0xff] (!%p1709_p1)  }
  0xc0   : > { %507 = vmatmul.mubr.bf16.vlgmr.msra.gmra.mrb[0].mxu0 %v2066_v18  ;;  %527 = vmatmul.mubr.bf16.vlgmr.msra.gmra.mrb[0].mxu1 %v2067_v19  ;;  %v2086_v18 = vld [vmem:[#allocation7 + $0x58] sm:$0xff] (!%p1709_p1)  }
  0xc1   : > { %516 = vmatprep.mubr.bf16.mxu0 %v2330_v3  ;;  %536 = vmatprep.mubr.bf16.mxu1 %v2330_v3  ;;  %v2071_v3 = vld [vmem:[#allocation7 + $0x80] sm:$0xff] (!%p1709_p1)   ;;  %v2087_v19 = vld [vmem:[#allocation7 + $0x18] sm:$0xff] (!%p1709_p1)  }
  0xc2   : > { %1828 = vmatpush3.bf16.msra.mxu1 (!%p1709_p1), %v2071_v3  ;;  %1806 = vmatpush3.bf16.msra.mxu0 (!%p1709_p1), %v2075_v7  ;;  %v2113_v3 = vld [vmem:[#allocation7 + $0x198] sm:$0xff] (!%p1709_p1)   ;;  %v2117_v7 = vld [vmem:[#allocation7 + $0x1a0] sm:$0xff] (!%p1709_p1)  }
  0xc3   : > { %1829 = vmatprep.subr.bf16.mxu1 (!%p1709_p1), %v2072_v4  ;;  %1807 = vmatprep.subr.bf16.mxu0 (!%p1709_p1), %v2078_v10  ;;  %v2115_v4 = vld [vmem:[#allocation7 + $0x110] sm:$0xff] (!%p1709_p1)   ;;  %v2122_v10 = vld [vmem:[#allocation7 + $0x160] sm:$0xff] (!%p1709_p1)  }
  0xc6   : > { %1830 = vmatpush3.bf16.msra.mxu1 (!%p1709_p1), %v2073_v5  ;;  %1808 = vmatpush3.bf16.msra.mxu0 (!%p1709_p1), %v2079_v11  ;;  %v2116_v5 = vld [vmem:[#allocation7 + $0x1e0] sm:$0xff] (!%p1709_p1)   ;;  %v2121_v11 = vld [vmem:[#allocation7 + $0x1a8] sm:$0xff] (!%p1709_p1)  }
  0xc7   : > { %1831 = vmatprep.subr.bf16.mxu1 (!%p1709_p1), %v2076_v8  ;;  %1809 = vmatprep.subr.bf16.mxu0 (!%p1709_p1), %v2082_v14  ;;  %v2119_v8 = vld [vmem:[#allocation7 + $0x118] sm:$0xff] (!%p1709_p1)   ;;  %v2126_v14 = vld [vmem:[#allocation7 + $0x168] sm:$0xff] (!%p1709_p1)  }
  0xc8   : > { %517 = vmatmul.mubr.bf16.gmra.mrb[4].mxu0 %v2068_v20  ;;  %537 = vmatmul.mubr.bf16.gmra.mrb[4].mxu1 %v2069_v21  ;;  %v2088_v20 = vld [vmem:[#allocation7 + $0xe8] sm:$0xff] (!%p1709_p1)  }
  0xc9   : > { %v2089_v21 = vld [vmem:[#allocation7 + $0xa8] sm:$0xff] (!%p1709_p1)  }
  0xca   : > { %1832 = vmatpush3.bf16.msra.mxu1 (!%p1709_p1), %v2077_v9  ;;  %1810 = vmatpush3.bf16.msra.mxu0 (!%p1709_p1), %v2083_v15  ;;  %v2120_v9 = vld [vmem:[#allocation7 + $0x1e8] sm:$0xff] (!%p1709_p1)   ;;  %v2125_v15 = vld [vmem:[#allocation7 + $0x1b0] sm:$0xff] (!%p1709_p1)  }
  0xcb   : > { %1833 = vmatprep.subr.bf16.mxu1 (!%p1709_p1), %v2080_v12  ;;  %1811 = vmatprep.subr.bf16.mxu0 (!%p1709_p1), %v2086_v18  ;;  %v2123_v12 = vld [vmem:[#allocation7 + $0x120] sm:$0xff] (!%p1709_p1)   ;;  %v2130_v18 = vld [vmem:[#allocation7 + $0x170] sm:$0xff] (!%p1709_p1)  }
  0xce   : > { %1834 = vmatpush3.bf16.msra.mxu1 (!%p1709_p1), %v2081_v13  ;;  %1812 = vmatpush3.bf16.msra.mxu0 (!%p1709_p1), %v2087_v19  ;;  %v2124_v13 = vld [vmem:[#allocation7 + $0x1f0] sm:$0xff] (!%p1709_p1)   ;;  %v2129_v19 = vld [vmem:[#allocation7 + $0x1b8] sm:$0xff] (!%p1709_p1)  }
  0xcf   : > { %1835 = vmatprep.subr.bf16.mxu1 (!%p1709_p1), %v2084_v16  ;;  %v2127_v16 = vld [vmem:[#allocation7 + $0x128] sm:$0xff] (!%p1709_p1)  }
  0xd2   : > { %1836 = vmatpush3.bf16.msra.mxu1 (!%p1709_p1), %v2085_v17  ;;  %v2128_v17 = vld [vmem:[#allocation7 + $0x1f8] sm:$0xff] (!%p1709_p1)  }
  0xd3   : > { %1837 = vmatprep.subr.bf16.mxu1 (!%p1709_p1), %v2088_v20  ;;  %v2131_v20 = vld [vmem:[#allocation7 + $0x130] sm:$0xff] (!%p1709_p1)  }
  0xd6   : > { %1838 = vmatpush3.bf16.msra.mxu1 (!%p1709_p1), %v2089_v21 }
 0x193   : > { %v508_v26 = vpop.f32.mrb[0].mxu0  ;;  %v528_v27 = vpop.f32.mrb[0].mxu1 }
 0x194   : > { %v545_v30 = vadd.f32 %v508_v26, %v335_v22  ;;  %v553_v31 = vadd.f32 %v528_v27, %v343_v23  ;;  %v510_v32 = vpop.f32.mrb[1].mxu0  ;;  %v530_v33 = vpop.f32.mrb[1].mxu1  ;;  %v2090_v22 = vld [vmem:[#allocation7 + $0x60] sm:$0xff] (!%p1709_p1)   ;;  %v2094_v26 = vld [vmem:[#allocation7 + $0x68] sm:$0xff] (!%p1709_p1)   ;;  %v593_v27 = vlaneseq (!%p1709_p1) }
 0x195   : > { %v546_v36 = vadd.f32 %v510_v32, %v336_v24  ;;  %v554_v37 = vadd.f32 %v530_v33, %v344_v25  ;;  %v512_v38 = vpop.f32.mrb[2].mxu0  ;;  %v532_v39 = vpop.f32.mrb[2].mxu1  ;;  %v2091_v23 = vld [vmem:[#allocation7 + $0x20] sm:$0xff] (!%p1709_p1)   ;;  %1813 = vmatprep.subr.bf16.mxu0 (!%p1709_p1), %v2090_v22  ;;  %v2092_v24 = vld [vmem:[#allocation7 + $0xf0] sm:$0xff] (!%p1709_p1)  }
 0x196   : > { %559 = vst [vmem:[#allocation2] sm:$0xff] %v545_v30  ;;  %567 = vst [vmem:[#allocation2 + $0x40] sm:$0xff] %v553_v31  ;;  %v547_v40 = vadd.f32 %v512_v38, %v337_v28  ;;  %v555_v41 = vadd.f32 %v532_v39, %v345_v29  ;;  %v514_v42 = vpop.f32.mrb[3].mxu0  ;;  %v534_v43 = vpop.f32.mrb[3].mxu1  ;;  %1814 = vmatpush3.bf16.msra.mxu0 (!%p1709_p1), %v2091_v23  ;;  %v2093_v25 = vld [vmem:[#allocation7 + $0xb0] sm:$0xff] (!%p1709_p1)   ;;  %1839 = vmatprep.subr.bf16.mxu1 (!%p1709_p1), %v2092_v24  ;;  %v2095_v28 = vld [vmem:[#allocation7 + $0x28] sm:$0xff] (!%p1709_p1)  }
 0x197   : > { %560 = vst [vmem:[#allocation2 + $0x8] sm:$0xff] %v546_v36  ;;  %568 = vst [vmem:[#allocation2 + $0x48] sm:$0xff] %v554_v37  ;;  %v548_v44 = vadd.f32 %v514_v42, %v338_v34  ;;  %v556_v45 = vadd.f32 %v534_v43, %v346_v35  ;;  %1815 = vmatprep.subr.bf16.mxu0 (!%p1709_p1), %v2094_v26  ;;  %v2096_v29 = vld [vmem:[#allocation7 + $0xf8] sm:$0xff] (!%p1709_p1)   ;;  %1840 = vmatpush3.bf16.msra.mxu1 (!%p1709_p1), %v2093_v25  ;;  %v2098_v31 = vld [vmem:[#allocation7 + $0x70] sm:$0xff] (!%p1709_p1)   ;;  %v594_v32 = vshrl.u32 (!%p1709_p1), %v593_v27, 7 }
 0x198   : > { %561 = vst [vmem:[#allocation2 + $0x10] sm:$0xff] %v547_v40  ;;  %569 = vst [vmem:[#allocation2 + $0x50] sm:$0xff] %v555_v41  ;;  %v2097_v30 = vld [vmem:[#allocation7 + $0xb8] sm:$0xff] (!%p1709_p1)   ;;  %1841 = vmatprep.subr.bf16.mxu1 (!%p1709_p1), %v2096_v29  ;;  %v2099_v33 = vld [vmem:[#allocation7 + $0x30] sm:$0xff] (!%p1709_p1)  }
 0x199   : > { %562 = vst [vmem:[#allocation2 + $0x18] sm:$0xff] %v548_v44  ;;  %570 = vst [vmem:[#allocation2 + $0x58] sm:$0xff] %v556_v45  ;;  %v2100_v38 = vld [vmem:[#allocation7 + $0x1c0] sm:$0xff] (!%p1709_p1)   ;;  %v595_v39 = vsub.s32 (!%p1709_p1), 0, %v594_v32  ;;  %v2102_v44 = vld [vmem:[#allocation7 + $0x78] sm:$0xff] (!%p1709_p1)   ;;  %v599_v45 = vsub.s32 (!%p1709_p1), 1, %v594_v32 }
 0x19a   : > { %1816 = vmatpush3.bf16.msra.mxu0 (!%p1709_p1), %v2095_v28 }
 0x19b   : > { %v518_v50 = vpop.f32.mrb[4].mxu0  ;;  %v538_v51 = vpop.f32.mrb[4].mxu1  ;;  %576 = sbr.rel (%p1709_p1) target bundleno = 701 (0x2bd), region = 60  ;;  %1817 = vmatprep.subr.bf16.mxu0 (!%p1709_p1), %v2098_v31  ;;  %1842 = vmatpush3.bf16.msra.mxu1 (!%p1709_p1), %v2097_v30 }
 0x19c   : > { %v549_v53 = vadd.f32 %v518_v50, %v339_v46  ;;  %v557_v54 = vadd.f32 %v538_v51, %v347_v47  ;;  %v520_v55 = vpop.f32.mrb[5].mxu0  ;;  %v540_v56 = vpop.f32.mrb[5].mxu1  ;;  %1871 = vmatprep.subr.bf16.mxu1 (!%p1709_p1), %v2100_v38 }
 0x19d   : > { %v550_v58 = vadd.f32 %v520_v55, %v340_v48  ;;  %v558_v59 = vadd.f32 %v540_v56, %v348_v49  ;;  %v522_v60 = vpop.f32.mrb[6].mxu0  ;;  %v542_v61 = vpop.f32.mrb[6].mxu1  ;;  %v785_v35 = vld [vmem:[#allocation2] sm:$0x1e] (!%p1709_p1)  ;;  %v2101_v48 = vld [vmem:[#allocation7 + $0x180] sm:$0xff] (!%p1709_p1)  }
 0x19e   : > { %563 = vst [vmem:[#allocation2 + $0x20] sm:$0xff] %v549_v53  ;;  %571 = vst [vmem:[#allocation2 + $0x60] sm:$0x3] %v557_v54  ;;  %v551_v62 = vadd.f32 %v522_v60, %v341_v52  ;;  %v524_v63 = vpop.f32.mrb[7].mxu0  ;;  %v543_v0 = vpop.f32.mrb[7].mxu1  ;;  %1818 = vmatpush3.bf16.msra.mxu0 (!%p1709_p1), %v2099_v33  ;;  %v787_v37 = vpack.c.bf16 (!%p1709_p1), %v785_v35, %v785_v35  ;;  %v2103_v49 = vld [vmem:[#allocation7 + $0x38] sm:$0xff] (!%p1709_p1)  }
 0x19f   : > { %564 = vst [vmem:[#allocation2 + $0x28] sm:$0xff] %v550_v58  ;;  %572 = vst [vmem:[#allocation2 + $0x68] sm:$0x3] %v558_v59  ;;  %v552_v1 = vadd.f32 %v524_v63, %v342_v57  ;;  %v786_v34 = vld [vmem:[#allocation2 + $0x8] sm:$0x1e] (!%p1709_p1)  ;;  %1819 = vmatprep.subr.bf16.mxu0 (!%p1709_p1), %v2102_v44  ;;  %v2104_v52 = vld [vmem:[#allocation7 + $0x1c8] sm:$0xff] (!%p1709_p1)  }
 0x1a0   : > { %565 = vst [vmem:[#allocation2 + $0x30] sm:$0xff] %v551_v62  ;;  %v788_v36 = vpack.c.bf16 (!%p1709_p1), %v786_v34, %v786_v34  ;;  %v823_v42 = vshrl.u32 (!%p1709_p1), %v787_v37, 16  ;;  %v825_v43 = vshll.u32 (!%p1709_p1), %v787_v37, 16  ;;  %v591_v53 = vld [vmem:[#allocation2] ss:$8 sm:$0x3] (!%p1709_p1) }
 0x1a1   : > { %566 = vst [vmem:[#allocation2 + $0x38] sm:$0xff] %v552_v1  ;;  %v596_v54 = vrot.slane (!%p1709_p1), %v591_v53, %v595_v39  ;;  %v600_v55 = vrot.slane (!%p1709_p1), %v591_v53, %v599_v45  ;;  %v2106_v56 = vld [vmem:[#allocation7 + $0x140] sm:$0xff] (!%p1709_p1)   ;;  %v2105_v57 = vld [vmem:[#allocation7 + $0x188] sm:$0xff] (!%p1709_p1)   ;;  %v2108_v61 = vld [vmem:[#allocation7 + $0x1d0] sm:$0xff] (!%p1709_p1)  }
 0x1a2   : > { %v830_v40 = vshrl.u32 %v788_v36, 16  ;;  %v832_v41 = vshll.u32 %v788_v36, 16  ;;  %v827_v47 = vrot.slane %v825_v43, 1  ;;  %1820 = vmatpush3.bf16.msra.mxu0 %v2103_v49  ;;  %v2107_v60 = vld [vmem:[#allocation7 + $0x100] sm:$0xff]   ;;  %v2110_v62 = vld [vmem:[#allocation7 + $0x148] sm:$0xff]   ;;  %v2109_v63 = vld [vmem:[#allocation7 + $0x190] sm:$0xff]  }
 0x1a3   : > { %v603_v58 = vpack.c.bf16 %v596_v54, %v596_v54  ;;  %v604_v59 = vpack.c.bf16 %v600_v55, %v600_v55  ;;  %1849 = vmatprep.subr.bf16.mxu0 %v2106_v56  ;;  %v2111_v0 = vld [vmem:[#allocation7 + $0x108] sm:$0xff]   ;;  %v2112_v1 = vld [vmem:[#allocation7 + $0x1d8] sm:$0xff]   ;;  %v1260_v21 = vld [vmem:[#allocation2 + $0x18] sm:$0xc0] }
 0x1a4   : > { %v834_v46 = vrot.slane %v832_v41, 1  ;;  %v828_v51 = vor.u32 %v827_v47, %v823_v42  ;;  %v1266_v24 = vld [vmem:[#allocation2 + $0x48] sm:$0xff]  ;;  %v1259_v27 = vld [vmem:[#allocation2 + $0x10] sm:$0xc0]  ;;  %v1265_v30 = vld [vmem:[#allocation2 + $0x40] sm:$0xff] }
 0x1a5   : > { %765 = vmatprep.mubr.bf16.mxu0 %v604_v59  ;;  %v1261_v28 = vld [vmem:[#allocation2 + $0x20] sm:$0xff]  ;;  %v1012_v38 = vld [vmem:[#allocation2 + $0x8] sm:$0xe0]  ;;  %v1268_v39 = vld [vmem:[#allocation2 + $0x58] sm:$0xff] }
 0x1a6   : > { %v835_v50 = vor.u32 %v834_v46, %v830_v40  ;;  %766 = vmatmul.mubr.bf16.vlgmr.msra.gmra.mrb[0].mxu0 %v603_v58  ;;  %v1262_v22 = vld [vmem:[#allocation2 + $0x28] sm:$0xff]  ;;  %v1271_v31 = vpack.c.bf16 %v1261_v28, %v1259_v27  ;;  %v2132_v35 = vld [vmem:[#allocation7 + $0x178] sm:$0xff]   ;;  %v1014_v42 = vld [vmem:[#allocation2 + $0x18] sm:$0x3f] }
 0x1a7   : > { %1850 = vmatpush3.bf16.msra.mxu0 %v2107_v60  ;;  %v1272_v25 = vpack.c.bf16 %v1262_v22, %v1260_v21  ;;  %v1263_v29 = vld [vmem:[#allocation2 + $0x30] sm:$0xff]  ;;  %v2133_v36 = vld [vmem:[#allocation7 + $0x138] sm:$0xff]   ;;  %v1016_v45 = vpack.c.bf16 %v1014_v42, %v1012_v38  ;;  %v1270_v47 = vld [vmem:[#allocation2 + $0x68] sm:$0x3] }
 0x1a8   : > { %966 = vmatprep.mubr.bf16.mxu1 %v835_v50  ;;  %1851 = vmatprep.subr.bf16.mxu0 %v2110_v62  ;;  %v1264_v23 = vld [vmem:[#allocation2 + $0x38] sm:$0xff]  ;;  %v1273_v34 = vpack.c.bf16 %v1265_v30, %v1263_v29  ;;  %v1317_v37 = vrot.slane %v1271_v31, 3  ;;  %v1011_v43 = vld [vmem:[#allocation2] sm:$0xe0]  ;;  %v1267_v44 = vld [vmem:[#allocation2 + $0x50] sm:$0xff] }
 0x1a9   : > { %967 = vmatmul.mubr.bf16.vlgmr.msra.gmra.mrb[0].mxu1 %v828_v51  ;;  %v1274_v26 = vpack.c.bf16 %v1266_v24, %v1264_v23  ;;  %v1320_v32 = vrot.slane %v1272_v25, 3  ;;  %v1013_v46 = vld [vmem:[#allocation2 + $0x10] sm:$0x3f]  ;;  %v1276_v51 = vpack.c.bf16 %v1270_v47, %v1268_v39  ;;  %v1059_v53 = vshrl.u32 %v1016_v45, 16  ;;  %v2694_v39 = vld [vmem:[%s2821_s3 + $0x3] ss:$0 sm:$0xff] }
 0x1aa   : > { %1872 = vmatpush3.bf16.msra.mxu1 %v2101_v48  ;;  %v1318_v41 = vrot.slane %v1273_v34, 3  ;;  %v1269_v48 = vld [vmem:[#allocation2 + $0x60] sm:$0x3]  ;;  %v1015_v50 = vpack.c.bf16 %v1013_v46, %v1011_v43  ;;  %v1062_v54 = vshll.u32 %v1016_v45, 16 }
 0x1ab   : > { %1873 = vmatprep.subr.bf16.mxu1 %v2104_v52  ;;  %1852 = vmatpush3.bf16.msra.mxu0 %v2111_v0  ;;  %v1321_v33 = vrot.slane %v1274_v26, 3  ;;  %v1275_v52 = vpack.c.bf16 %v1269_v48, %v1267_v44  ;;  %v1061_v59 = vrot.slane %v1059_v53, 2 }
 0x1ac   : > { %1853 = vmatprep.subr.bf16.mxu0 %v2114_v2  ;;  %v1319_v49 = vsel %vm1316_vm0, %v1317_v37, %v1318_v41  ;;  %v1051_v55 = vshrl.u32 %v1015_v50, 16  ;;  %v1054_v56 = vshll.u32 %v1015_v50, 16  ;;  %v1064_v60 = vrot.slane %v1062_v54, 3 }
 0x1ad   : > { %v1322_v40 = vsel %vm1316_vm0, %v1320_v32, %v1321_v33  ;;  %v1323_v58 = vrot.slane %v1275_v52, 3 }
 0x1ae   : > { %1874 = vmatpush3.bf16.msra.mxu1 %v2105_v57  ;;  %1461 = vmatprep.mubr.bf16.mxu1 %v1322_v40  ;;  %v1325_v57 = vrot.slane %v1276_v51, 3  ;;  %v1056_v62 = vrot.slane %v1054_v56, 3  ;;  %v1065_v0 = vor.u32 %v1064_v60, %v1061_v59  ;;  %v1766_v56 = vld [vmem:[%s2821_s3 + $0x2] ss:$0 sm:$0xff] }
 0x1af   : > { %1875 = vmatprep.subr.bf16.mxu1 %v2108_v61  ;;  %1854 = vmatpush3.bf16.msra.mxu0 %v2115_v4  ;;  %v1053_v61 = vrot.slane %v1051_v55, 2  ;;  %v1324_v2 = vsel %vm1316_vm0, %v1318_v41, %v1323_v58 }
 0x1b0   : > { %1855 = vmatprep.subr.bf16.mxu0 %v2118_v6  ;;  %1196 = vmatprep.mubr.bf16.mxu0 %v1065_v0  ;;  %v1743_v6 = vld [vmem:[%s2820_s10 + $0x1] ss:$0 sm:$0xff] }
 0x1b2   : > { %1876 = vmatpush3.bf16.msra.mxu1 %v2109_v63  ;;  %v1326_v63 = vsel %vm1316_vm0, %v1321_v33, %v1325_v57 }
 0x1b3   : > { %1877 = vmatprep.subr.bf16.mxu1 %v2112_v1  ;;  %1856 = vmatpush3.bf16.msra.mxu0 %v2119_v8  ;;  %v1057_v1 = vor.u32 %v1056_v62, %v1053_v61 }
 0x1b4   : > { %1857 = vmatprep.subr.bf16.mxu0 %v2122_v10 }
 0x1b6   : > { %1878 = vmatpush3.bf16.msra.mxu1 %v2113_v3  ;;  %v2331_v3 = vmov 0  }
 0x1b7   : > { %1879 = vmatprep.subr.bf16.mxu1 %v2116_v5  ;;  %1858 = vmatpush3.bf16.msra.mxu0 %v2123_v12  ;;  %577 = vst [vmem:[%s2627_s12] sm:$0xff] %v2331_v3  ;;  %579 = vst [vmem:[%s2627_s12 + $0x10] sm:$0xff] %v2331_v3 }
 0x1b8   : > { %1859 = vmatprep.subr.bf16.mxu0 %v2126_v14  ;;  %581 = vst [vmem:[%s2627_s12 + $0x20] sm:$0xff] %v2331_v3  ;;  %583 = vst [vmem:[%s2627_s12 + $0x30] sm:$0xff] %v2331_v3  ;;  %v773_v14 = vld [vmem:[%s2820_s10] sm:$0x1] }
 0x1b9   : > { %585 = vst [vmem:[%s2627_s12 + $0x40] sm:$0xff] %v2331_v3  ;;  %587 = vst [vmem:[%s2627_s12 + $0x50] sm:$0xff] %v2331_v3 }
 0x1ba   : > { %1880 = vmatpush3.bf16.msra.mxu1 %v2117_v7  ;;  %589 = vst [vmem:[%s2627_s12 + $0x60] sm:$0x11] %v2331_v3  ;;  %578 = vst [vmem:[%s2627_s12 + $0x8] sm:$0xff] %v2331_v3 }
 0x1bb   : > { %1881 = vmatprep.subr.bf16.mxu1 %v2120_v9  ;;  %1860 = vmatpush3.bf16.msra.mxu0 %v2127_v16  ;;  %580 = vst [vmem:[%s2627_s12 + $0x18] sm:$0xff] %v2331_v3  ;;  %582 = vst [vmem:[%s2627_s12 + $0x28] sm:$0xff] %v2331_v3  ;;  %v1745_v9 = vld [vmem:[%s2821_s3 + $0x1] ss:$0 sm:$0xff] }
 0x1bc   : > { %1861 = vmatprep.subr.bf16.mxu0 %v2130_v18  ;;  %584 = vst [vmem:[%s2627_s12 + $0x38] sm:$0xff] %v2331_v3  ;;  %586 = vst [vmem:[%s2627_s12 + $0x48] sm:$0xff] %v2331_v3  ;;  %v775_v18 = vld [vmem:[%s2821_s3] sm:$0x1] }
 0x1bd   : > { %588 = vst [vmem:[%s2627_s12 + $0x58] sm:$0xff] %v2331_v3  ;;  %590 = vst [vmem:[%s2627_s12 + $0x68] sm:$0x11] %v2331_v3 }
 0x1be   : > { %1882 = vmatpush3.bf16.msra.mxu1 %v2121_v11  ;;  %v782_v26 = vld [vmem:[%s2627_s12] sm:$0x1]  ;;  %v1008_v30 = vld [vmem:[%s2627_s12 + $0x4] sm:$0x7] }
 0x1bf   : > { %1883 = vmatprep.subr.bf16.mxu1 %v2124_v13  ;;  %1862 = vmatpush3.bf16.msra.mxu0 %v2131_v20 }
 0x1c0   : > { %1863 = vmatprep.subr.bf16.mxu0 %v2132_v35 }
 0x1c2   : > { %1884 = vmatpush3.bf16.msra.mxu1 %v2125_v15 }
 0x1c3   : > { %1885 = vmatprep.subr.bf16.mxu1 %v2128_v17  ;;  %1864 = vmatpush3.bf16.msra.mxu0 %v2133_v36  ;;  %v2689_v36 = vld [vmem:[%s2820_s10 + $0x3] ss:$0 sm:$0xff] }
 0x1c6   : > { %1886 = vmatpush3.bf16.msra.mxu1 %v2129_v19  ;;  %1197 = vmatmul.mubr.bf16.vlgmr.msra.gmra.mrb[4].mxu0 %v1057_v1 }
 0x1c9   : > { %1462 = vmatmul.mubr.bf16.vlgmr.msra.gmra.mrb[4].mxu1 %v1319_v49  ;;  %v1764_v49 = vld [vmem:[%s2820_s10 + $0x2] ss:$0 sm:$0xff] }
 0x1ca   : > { %1469 = vmatprep.mubr.bf16.mxu1 %v1326_v63 }
 0x1d1   : > { %1470 = vmatmul.mubr.bf16.gmra.mrb[8].mxu1 %v1324_v2 }
 0x1d2   : > { %1477 = vmatprep.mubr.bf16.mxu1 %v1325_v57 }
 0x1d9   : > { %1478 = vmatmul.mubr.bf16.gmra.mrb[12].mxu1 %v1323_v58 }
 0x279   : > { %v1821_v11 = vpop.f32.mrb[0].mxu0 }
 0x27a   : > { %v1822_v13 = vpop.f32.mrb[1].mxu0 }
 0x27b   : > { %v1823_v15 = vadd.f32 %v1822_v13, %v1821_v11  ;;  %v1824_v16 = vpop.f32.mrb[2].mxu0 }
 0x27c   : > { %v1843_v4 = vpop.f32.mrb[0].mxu1  ;;  %v1825_v19 = vpop.f32.mrb[3].mxu0 }
 0x27d   : > { %v1844_v5 = vpop.f32.mrb[1].mxu1  ;;  %v774_v20 = vmul.f32 %v1823_v15, %v773_v14 }
 0x27e   : > { %v1845_v7 = vadd.f32 %v1844_v5, %v1843_v4  ;;  %v1846_v8 = vpop.f32.mrb[2].mxu1 }
 0x27f   : > { %v1847_v10 = vpop.f32.mrb[3].mxu1  ;;  %v776_v22 = vadd.f32 %v775_v18, %v774_v20 }
 0x280   : > { %v982_v12 = vmul.f32 %v1845_v7, %v1743_v6 }
 0x281   : > { %v777_v24 = vmax.f32 %v776_v22, 0.0 }
 0x282   : > { %v991_v17 = vadd.f32 %v1745_v9, %v982_v12 }
 0x283   : > { %v778_v27 = vpack.c.bf16 %v777_v24, %v777_v24 }
 0x284   : > { %v992_v21 = vmax.f32 %v991_v17, 0.0 }
 0x285   : > { %v783_v31 = vsel %vm781_vm5, %v778_v27, %v782_v26 }
 0x286   : > { %v1797_v23 = vpack.c.bf16 %v992_v21, %v992_v21  ;;  %784 = vst [vmem:[%s2627_s12] sm:$0x1] %v783_v31 }
 0x288   : > { %v998_v25 = vshrl.u32 %v1797_v23, 16  ;;  %v1001_v29 = vshll.u32 %v1797_v23, 16 }
 0x28a   : > { %v1000_v28 = vrot.slane %v998_v25, 7 }
 0x28c   : > { %v1003_v32 = vor.u32 %v1001_v29, %v1000_v28 }
 0x28e   : > { %v1009_v33 = vsel %vm1007_vm6, %v1003_v32, %v1008_v30 }
 0x28f   : > { %1010 = vst [vmem:[%s2627_s12 + $0x4] sm:$0x7] %v1009_v33 }
 0x299   : > { %v1865_v45 = vpop.f32.mrb[4].mxu0 }
 0x29a   : > { %v1866_v48 = vpop.f32.mrb[5].mxu0 }
 0x29b   : > { %v1867_v51 = vadd.f32 %v1866_v48, %v1865_v45  ;;  %v1868_v53 = vpop.f32.mrb[6].mxu0 }
 0x29c   : > { %v1887_v34 = vpop.f32.mrb[4].mxu1  ;;  %v1869_v59 = vpop.f32.mrb[7].mxu0 }
 0x29d   : > { %v1888_v35 = vpop.f32.mrb[5].mxu1  ;;  %v1213_v60 = vmul.f32 %v1867_v51, %v1764_v49  ;;  %v1870_v61 = vadd.f32 %v1869_v59, %v1868_v53 }
 0x29e   : > { %v1889_v37 = vadd.f32 %v1888_v35, %v1887_v34  ;;  %v1890_v38 = vpop.f32.mrb[6].mxu1  ;;  %v1255_v34 = vld [vmem:[%s2627_s12 + $0x8] sm:$0xc] }
 0x29f   : > { %v1891_v40 = vpop.f32.mrb[7].mxu1  ;;  %v1223_v4 = vadd.f32 %v1766_v56, %v1213_v60  ;;  %v1214_v5 = vmul.f32 %v1870_v61, %v1764_v49 }
 0x2a0   : > { %v1493_v41 = vmul.f32 %v1889_v37, %v2689_v36  ;;  %v1892_v42 = vadd.f32 %v1891_v40, %v1890_v38 }
 0x2a1   : > { %v1225_v10 = vmax.f32 %v1223_v4, 0.0  ;;  %v1224_v11 = vadd.f32 %v1766_v56, %v1214_v5 }
 0x2a2   : > { %v1506_v43 = vadd.f32 %v2694_v39, %v1493_v41  ;;  %v1494_v44 = vmul.f32 %v1892_v42, %v2689_v36 }
 0x2a3   : > { %v1798_v16 = vpack.c.bf16 %v1225_v10, %v1225_v10  ;;  %v1226_v17 = vmax.f32 %v1224_v11, 0.0 }
 0x2a4   : > { %v1511_v46 = vmax.f32 %v1506_v43, 0.0  ;;  %v1507_v47 = vadd.f32 %v2694_v39, %v1494_v44  ;;  %v1893_v50 = vpop.f32.mrb[8].mxu1 }
 0x2a5   : > { %v1894_v52 = vpop.f32.mrb[9].mxu1  ;;  %v1237_v23 = vshrl.u32 %v1798_v16, 16  ;;  %v1240_v24 = vshll.u32 %v1798_v16, 16  ;;  %v1799_v25 = vpack.c.bf16 %v1226_v17, %v1226_v17 }
 0x2a6   : > { %v1800_v54 = vpack.c.bf16 %v1511_v46, %v1511_v46  ;;  %v1512_v55 = vmax.f32 %v1507_v47, 0.0  ;;  %v1895_v57 = vadd.f32 %v1894_v52, %v1893_v50  ;;  %v1896_v58 = vpop.f32.mrb[10].mxu1 }
 0x2a7   : > { %v1897_v62 = vpop.f32.mrb[11].mxu1  ;;  %v1239_v31 = vrot.slane %v1237_v23, 5  ;;  %v1242_v32 = vrot.slane %v1240_v24, 6  ;;  %v1246_v33 = vshll.u32 %v1799_v25, 16 }
 0x2a8   : > { %v1534_v63 = vrot.slane %v1800_v54, 5  ;;  %v1801_v0 = vpack.c.bf16 %v1512_v55, %v1512_v55  ;;  %v1495_v1 = vmul.f32 %v1895_v57, %v2689_v36  ;;  %v1898_v2 = vadd.f32 %v1897_v62, %v1896_v58 }
 0x2a9   : > { %v1243_v41 = vor.u32 %v1242_v32, %v1239_v31 }
 0x2aa   : > { %v1535_v6 = vrot.slane %v1534_v63, 4  ;;  %1554 = vst [vmem:[%s2627_s12 + $0x1c] sm:$0x8] %v1534_v63  ;;  %v1536_v7 = vrot.slane %v1801_v0, 5  ;;  %v1508_v8 = vadd.f32 %v2694_v39, %v1495_v1  ;;  %v1496_v9 = vmul.f32 %v1898_v2, %v2689_v36 }
 0x2ab   : > { %v1244_v44 = vrot.slane %v1243_v41, 4  ;;  %v1256_v45 = vsel %vm1254_vm13, %v1243_v41, %v1255_v34 }
 0x2ac   : > { %v1537_v12 = vsel %vm2708_vm8, %v1535_v6, %v1536_v7  ;;  %v1513_v13 = vmax.f32 %v1508_v8, 0.0  ;;  %v1509_v14 = vadd.f32 %v2694_v39, %v1496_v9  ;;  %v1899_v15 = vpop.f32.mrb[12].mxu1  ;;  %v1538_v27 = vrot.slane %v1536_v7, 4  ;;  %1257 = vst [vmem:[%s2627_s12 + $0x8] sm:$0xc] %v1256_v45 }
 0x2ad   : > { %1555 = vst [vmem:[%s2627_s12 + $0x2c] sm:$0xf] %v1537_v12  ;;  %v1900_v18 = vpop.f32.mrb[13].mxu1 }
 0x2ae   : > { %v1802_v19 = vpack.c.bf16 %v1513_v13, %v1513_v13  ;;  %v1514_v20 = vmax.f32 %v1509_v14, 0.0  ;;  %v1901_v21 = vadd.f32 %v1900_v18, %v1899_v15  ;;  %v1902_v22 = vpop.f32.mrb[14].mxu1 }
 0x2af   : > { %v1903_v26 = vpop.f32.mrb[15].mxu1 }
 0x2b0   : > { %v1539_v28 = vrot.slane %v1802_v19, 5  ;;  %v1803_v29 = vpack.c.bf16 %v1514_v20, %v1514_v20  ;;  %v1497_v30 = vmul.f32 %v1901_v21, %v2689_v36  ;;  %v1248_v36 = vrot.slane %v1246_v33, 6 }
 0x2b2   : > { %v1540_v35 = vsel %vm2708_vm8, %v1538_v27, %v1539_v28  ;;  %v1541_v37 = vrot.slane %v1539_v28, 4  ;;  %v1542_v38 = vrot.slane %v1803_v29, 5  ;;  %v1510_v40 = vadd.f32 %v2694_v39, %v1497_v30 }
 0x2b3   : > { %1556 = vst [vmem:[%s2627_s12 + $0x3c] sm:$0xf] %v1540_v35  ;;  %v1249_v47 = vsel %vm1235_vm14, %v1244_v44, %v1248_v36 }
 0x2b4   : > { %v1543_v42 = vsel %vm2708_vm8, %v1541_v37, %v1542_v38  ;;  %v1515_v43 = vmax.f32 %v1510_v40, 0.0  ;;  %1258 = vst [vmem:[%s2627_s12 + $0x18] sm:$0x7] %v1249_v47  ;;  %v1544_v48 = vrot.slane %v1542_v38, 4 }
 0x2b5   : > { %1557 = vst [vmem:[%s2627_s12 + $0x4c] sm:$0xf] %v1543_v42 }
 0x2b6   : > { %v1804_v46 = vpack.c.bf16 %v1515_v43, %v1515_v43 }
 0x2b8   : > { %v1545_v39 = vrot.slane %v1804_v46, 5 }
 0x2ba   : > { %v1546_v49 = vsel %vm2708_vm8, %v1544_v48, %v1545_v39  ;;  %v1547_v50 = vrot.slane %v1545_v39, 4 }
 0x2bb   : > { %1558 = vst [vmem:[%s2627_s12 + $0x5c] sm:$0xf] %v1546_v49 }
 0x2bc   : > { %1559 = vst [vmem:[%s2627_s12 + $0x6c] sm:$0x1] %v1547_v50 }
 0x2bd PF: > { %s21_s28 = sadd.s32 1, %s2320_s28   ;;  %s2824_s17 = sld [smem:[#allocation15_spill]] }
 0x2be   : > { %p18_p5 = scmp.ge.s32.totalorder %s21_s28, 6   ;;  %s2825_s30 = sld [smem:[#allocation13_spill]] }
 0x2bf   : > { %s2826_s7 = sld [smem:[#allocation14_spill]]  ;;  %s2827_s18 = smov %s2284_s19 }
 0x2c0   : > { %s2828_s19 = smov %s2288_s20  ;;  %s2830_s21 = smov %s2296_s22 }
 0x2c1   : > { %s2831_s22 = smov %s2300_s23  ;;  %s2832_s23 = smov %s2503_s15 }
 0x2c2   : > { %s2833_s24 = smov %s2312_s26  ;;  %s2834_s25 = smov %s2316_s27 }
 0x2c3   : > { %s2829_s20 = smov %s2824_s17  ;;  %20 = sbr.rel (!%p18_p5) target bundleno = 14 (0xe), region = 114 }
 0x2c4   : > { %s2835_s26 = smov %s2825_s30 }
 0x2c5   : > { %s2836_s27 = smov %s2826_s7 }
 0x2ca   :  { %1581 = vsyncpa [#allocation4], 1 }
 0x2cb   :  { %1583 = vsyncpa [#allocation4 + $0x1], 1 }
 0x2cc   :  { %1584 = vsyncpa [#allocation6], 1 }
 0x2cd   :  { %1586 = vsyncpa [#allocation6 + $0x1], 1 }

</bundles_post_ra>
